<compile_context>
chip_gen: v6e
topology: v6e:2x2x1
jax: 0.10.0
libtpu: 0.0.40
codegen_flags: <defaults>
</compile_context>

<pallas_src>
import jax
import jax.numpy as jnp
from jax.experimental import pallas as pl
from jax.experimental.pallas import tpu as pltpu


def lstm_fc_kernel(x_ref, wih_hbm, whh_hbm, b_hbm, wfc_hbm, bfc_hbm,   # inputs
                   out_ref,                                            # output
                   wih_v, whh_v, b_v, wfc_v, bfc_v,                    # weight VMEM (1 copy)
                   gx_sc, h_sc, c_sc, dma_sem):                        # scratch
    """One grid step == one chunk of T_CHUNK timesteps.

    x_ref   : (T_CHUNK*Bp, I)  time-major chunk of inputs (row = t*Bp + b)
    w*_hbm  : raw HBM refs (memory_space=pl.ANY), copied once into w*_v scratch
    out_ref : (Bp, O)          written only on the last chunk
    gx_sc   : (T_CHUNK*Bp, 4Hp) chunk input projection
    h_sc/c_sc: (Bp, Hp)        recurrent state, persists across grid steps
    """
    chunk = pl.program_id(0)
    n_chunks = pl.num_programs(0)
    Bp, Hp = h_sc.shape
    t_chunk = gx_sc.shape[0] // Bp

    @pl.when(chunk == 0)
    def _():
        h_sc[...] = jnp.zeros_like(h_sc)
        c_sc[...] = jnp.zeros_like(c_sc)
        # Single-buffered weight load: HBM -> VMEM exactly once for the whole grid.
        copies = [
            pltpu.make_async_copy(wih_hbm, wih_v, dma_sem.at[0]),
            pltpu.make_async_copy(whh_hbm, whh_v, dma_sem.at[1]),
            pltpu.make_async_copy(b_hbm, b_v, dma_sem.at[2]),
        ]
        for cp in copies:
            cp.start()
        for cp in copies:
            cp.wait()

    # Non-recurrent input projection for the whole chunk: one MXU-friendly matmul
    # over T_CHUNK*Bp rows, bias broadcast added once per chunk.
    gx_sc[...] = (jnp.dot(x_ref[...], wih_v[...],
                          preferred_element_type=jnp.float32) + b_v[...])

    whh = whh_v[...]          # loaded once per chunk, reused by every step
    wdt = whh.dtype

    def step(t, carry):
        h, c = carry
        row = pl.multiple_of(t * Bp, Bp)
        gates = gx_sc[pl.ds(row, Bp), :] + jnp.dot(
            h.astype(wdt), whh, preferred_element_type=jnp.float32)
        # Hp is a multiple of 128 -> every gate slice is lane-aligned.
        i_g = jax.nn.sigmoid(gates[:, 0 * Hp:1 * Hp])
        f_g = jax.nn.sigmoid(gates[:, 1 * Hp:2 * Hp])
        g_g = jnp.tanh(gates[:, 2 * Hp:3 * Hp])
        o_g = jax.nn.sigmoid(gates[:, 3 * Hp:4 * Hp])
        c_new = f_g * c + i_g * g_g
        h_new = o_g * jnp.tanh(c_new)
        return h_new, c_new

    h, c = jax.lax.fori_loop(0, t_chunk, step, (h_sc[...], c_sc[...]),
                             unroll=True)
    h_sc[...] = h
    c_sc[...] = c

    @pl.when(chunk == n_chunks - 1)
    def _():
        # Final FC weights are only needed once -> DMA'd only here, never part of
        # the per-chunk pipelined/resident set.
        cp_w = pltpu.make_async_copy(wfc_hbm, wfc_v, dma_sem.at[3])
        cp_b = pltpu.make_async_copy(bfc_hbm, bfc_v, dma_sem.at[4])
        cp_w.start()
        cp_b.start()
        cp_w.wait()
        cp_b.wait()
        out = (jnp.dot(h.astype(wfc_v.dtype), wfc_v[...],
                       preferred_element_type=jnp.float32) + bfc_v[...])
        out_ref[...] = out.astype(out_ref.dtype)


def _round_up(n, m):
    return ((n + m - 1) // m) * m


def _nbytes(shape, dtype):
    n = 1
    for s in shape:
        n *= s
    return n * jnp.dtype(dtype).itemsize


def lstm_model_forward(x, w_ih, w_hh, b_ih, b_hh, w_fc, b_fc, *,
                       t_chunk=16, weight_dtype=jnp.float32):
    """x: (B, T, I) float32 (batch_first, like the PyTorch module).
    w_ih: (4H, I), w_hh: (4H, H), b_ih/b_hh: (4H,), w_fc: (O, H), b_fc: (O,)
    Returns (B, O) == fc(lstm(x)[0][:, -1, :]).

    weight_dtype=jnp.bfloat16 halves weight VMEM residency / HBM traffic
    (recommended on v7x); matmul accumulation stays float32 either way.
    """
    B, T, I = x.shape
    fourH = w_ih.shape[0]
    H = fourH // 4
    O = w_fc.shape[0]

    Bp = _round_up(max(B, 8), 8)      # pad batch to the f32 sublane tile (8)
    Hp = _round_up(H, 128)            # pad hidden so each gate is lane-aligned
    # Largest chunk length that divides T (avoids remainder masking in-kernel).
    tc = max(d for d in range(1, min(t_chunk, T) + 1) if T % d == 0)
    n_chunks = T // tc

    # ---- glue: layout transforms only.  Zero-padding is mathematically inert:
    # padded gate columns see 0 pre-activations -> padded h/c stay exactly 0,
    # and padded W_fc rows are 0 -> the FC output is unchanged. ----
    def pad_gate_cols(w):                       # (rows, 4H) -> (rows, 4Hp)
        w4 = w.reshape(w.shape[0], 4, H)
        w4 = jnp.pad(w4, ((0, 0), (0, 0), (0, Hp - H)))
        return w4.reshape(w.shape[0], 4 * Hp)

    wih_t = pad_gate_cols(jnp.transpose(w_ih).astype(jnp.float32))          # (I, 4Hp)
    whh_t = pad_gate_cols(jnp.transpose(w_hh).astype(jnp.float32))          # (H, 4Hp)
    whh_t = jnp.pad(whh_t, ((0, Hp - H), (0, 0)))                           # (Hp, 4Hp)
    b = pad_gate_cols((b_ih + b_hh).reshape(1, fourH).astype(jnp.float32))  # (1, 4Hp)
    wfc_t = jnp.pad(jnp.transpose(w_fc).astype(jnp.float32),
                    ((0, Hp - H), (0, 0)))                                  # (Hp, O)
    bfc = b_fc.reshape(1, O).astype(jnp.float32)                            # (1, O)

    # Time-major, batch padded, flattened so row t*Bp + b is (timestep t, batch b).
    x_tm = jnp.pad(jnp.transpose(x, (1, 0, 2)).astype(jnp.float32),
                   ((0, 0), (0, Bp - B), (0, 0)))
    x_flat = x_tm.reshape(T * Bp, I).astype(weight_dtype)

    wih_t = wih_t.astype(weight_dtype)
    whh_t = whh_t.astype(weight_dtype)
    wfc_t = wfc_t.astype(weight_dtype)

    # Explicit VMEM budget: single-buffered weights + double-buffered x chunk
    # + chunk-gates / state scratch, with ~50% headroom.
    est = (2 * _nbytes((tc * Bp, I), weight_dtype)
           + _nbytes((I, 4 * Hp), weight_dtype)
           + _nbytes((Hp, 4 * Hp), weight_dtype)
           + _nbytes((1, 4 * Hp), jnp.float32)
           + _nbytes((Hp, O), weight_dtype)
           + _nbytes((1, O), jnp.float32)
           + _nbytes((tc * Bp, 4 * Hp), jnp.float32)
           + 2 * _nbytes((Bp, Hp), jnp.float32)
           + 2 * _nbytes((Bp, O), jnp.float32))
    vmem_limit = min(100 * 1024 * 1024, max(32 * 1024 * 1024, int(1.5 * est)))

    out = pl.pallas_call(
        lstm_fc_kernel,
        out_shape=jax.ShapeDtypeStruct((Bp, O), jnp.float32),
        grid_spec=pltpu.PrefetchScalarGridSpec(
            num_scalar_prefetch=0,
            grid=(n_chunks,),
            in_specs=[
                # streaming input: pipelined (double-buffered) chunk of tc steps
                pl.BlockSpec((tc * Bp, I), lambda c: (c, 0)),
                # weights stay in HBM; copied ONCE into VMEM scratch in-kernel
                pl.BlockSpec(memory_space=pl.ANY),   # W_ih^T
                pl.BlockSpec(memory_space=pl.ANY),   # W_hh^T
                pl.BlockSpec(memory_space=pl.ANY),   # combined bias
                pl.BlockSpec(memory_space=pl.ANY),   # W_fc^T
                pl.BlockSpec(memory_space=pl.ANY),   # b_fc
            ],
            out_specs=pl.BlockSpec((Bp, O), lambda c: (0, 0)),
            scratch_shapes=[
                pltpu.VMEM((I, 4 * Hp), weight_dtype),        # W_ih (single copy)
                pltpu.VMEM((Hp, 4 * Hp), weight_dtype),       # W_hh (single copy)
                pltpu.VMEM((1, 4 * Hp), jnp.float32),         # bias
                pltpu.VMEM((Hp, O), weight_dtype),            # W_fc
                pltpu.VMEM((1, O), jnp.float32),              # b_fc
                pltpu.VMEM((tc * Bp, 4 * Hp), jnp.float32),   # chunk input gates
                pltpu.VMEM((Bp, Hp), jnp.float32),            # h state
                pltpu.VMEM((Bp, Hp), jnp.float32),            # c state
                pltpu.SemaphoreType.DMA((5,)),                # weight-load sems
            ],
        ),
        # The time axis is a true recurrence and the output block is revisited,
        # so it must stay "arbitrary".  (With a large batch on v7x, a leading
        # batch-shard grid axis marked "parallel" would split work over the 2 TCs.)
        compiler_params=pltpu.CompilerParams(
            dimension_semantics=("arbitrary",),
            vmem_limit_bytes=vmem_limit),
    )(x_flat, wih_t, whh_t, b, wfc_t, bfc)
    return out[:B]


def lstm_model_reference(x, w_ih, w_hh, b_ih, b_hh, w_fc, b_fc):
    """Pure-JAX reference matching nn.LSTM(batch_first=True) + nn.Linear."""
    B, T, I = x.shape
    H = w_hh.shape[1]

    def step(carry, x_t):
        h, c = carry
        gates = x_t @ w_ih.T + b_ih + h @ w_hh.T + b_hh
        i = jax.nn.sigmoid(gates[:, 0 * H:1 * H])
        f = jax.nn.sigmoid(gates[:, 1 * H:2 * H])
        g = jnp.tanh(gates[:, 2 * H:3 * H])
        o = jax.nn.sigmoid(gates[:, 3 * H:4 * H])
        c = f * c + i * g
        h = o * jnp.tanh(c)
        return (h, c), h

    h0 = jnp.zeros((B, H), jnp.float32)
    c0 = jnp.zeros((B, H), jnp.float32)
    (h_last, _), _ = jax.lax.scan(step, (h0, c0), jnp.transpose(x, (1, 0, 2)))
    return h_last @ w_fc.T + b_fc


if __name__ == "__main__":
    # Small shapes consistent with the module's forward.
    B, T, I, H, O = 2, 8, 16, 32, 4

    key = jax.random.PRNGKey(0)
    ks = jax.random.split(key, 7)
    bound = 1.0 / jnp.sqrt(H)  # PyTorch default uniform init range

    x = jax.random.normal(ks[0], (B, T, I), dtype=jnp.float32)
    w_ih = jax.random.uniform(ks[1], (4 * H, I), minval=-bound, maxval=bound)
    w_hh = jax.random.uniform(ks[2], (4 * H, H), minval=-bound, maxval=bound)
    b_ih = jax.random.uniform(ks[3], (4 * H,), minval=-bound, maxval=bound)
    b_hh = jax.random.uniform(ks[4], (4 * H,), minval=-bound, maxval=bound)
    w_fc = jax.random.uniform(ks[5], (O, H), minval=-bound, maxval=bound)
    b_fc = jax.random.uniform(ks[6], (O,), minval=-bound, maxval=bound)

    ref = lstm_model_reference(x, w_ih, w_hh, b_ih, b_hh, w_fc, b_fc)

    # float32 weights, 2 chunks of 4 timesteps (exercises cross-chunk state carry).
    out = lstm_model_forward(x, w_ih, w_hh, b_ih, b_hh, w_fc, b_fc, t_chunk=4)
    out = jax.block_until_ready(out)
    assert out.shape == (B, O)
    assert jnp.allclose(out, ref, rtol=1e-2, atol=1e-2), (out, ref)

    # bfloat16 weights (v7x-oriented): halved weight VMEM/HBM traffic, f32 accum.
    out_bf16 = lstm_model_forward(x, w_ih, w_hh, b_ih, b_hh, w_fc, b_fc,
                                  t_chunk=8, weight_dtype=jnp.bfloat16)
    out_bf16 = jax.block_until_ready(out_bf16)
    assert jnp.allclose(out_bf16, ref, rtol=1e-1, atol=1e-1), (out_bf16, ref)

    print("KERNEL_OK")
</pallas_src>

<mosaic_0001>
module attributes {stable_mosaic.version = 11 : i64} {
  func.func @lstm_fc_kernel(%arg0: i32, %arg1: memref<32x16xf32, #tpu.memory_space<vmem>>, %arg2: memref<16x512xf32, #tpu.memory_space<any>>, %arg3: memref<128x512xf32, #tpu.memory_space<any>>, %arg4: memref<1x512xf32, #tpu.memory_space<any>>, %arg5: memref<128x4xf32, #tpu.memory_space<any>>, %arg6: memref<1x4xf32, #tpu.memory_space<any>>, %arg7: memref<8x4xf32, #tpu.memory_space<vmem>>, %arg8: memref<16x512xf32, #tpu.memory_space<vmem>>, %arg9: memref<128x512xf32, #tpu.memory_space<vmem>>, %arg10: memref<1x512xf32, #tpu.memory_space<vmem>>, %arg11: memref<128x4xf32, #tpu.memory_space<vmem>>, %arg12: memref<1x4xf32, #tpu.memory_space<vmem>>, %arg13: memref<32x512xf32, #tpu.memory_space<vmem>>, %arg14: memref<8x128xf32, #tpu.memory_space<vmem>>, %arg15: memref<8x128xf32, #tpu.memory_space<vmem>>, %arg16: memref<5x!tpu.dma_semaphore, #tpu.memory_space<semaphore_mem>>) attributes {dimension_semantics = [#tpu.dimension_semantics<arbitrary>], iteration_bounds = array<i64: 2>, scalar_prefetch = 0 : i64, scratch_operands = 9 : i64, tpu.core_type = #tpu.core_type<tc>, window_params = [{transform_indices = @transform_0, window_bounds = array<i64: 32, 16>}, {}, {}, {}, {}, {}, {pipeline_mode = #tpu.pipeline_mode<synchronous>, transform_indices = @transform_6, window_bounds = array<i64: 8, 4>}]} {
    %c0_i32 = arith.constant 0 : i32
    %0 = arith.cmpi eq, %arg0, %c0_i32 : i32
    %1 = arith.extui %0 : i1 to i32
    %c0_i32_0 = arith.constant 0 : i32
    %2 = arith.cmpi ne, %1, %c0_i32_0 : i32
    scf.if %2 {
      %cst_44 = arith.constant 0.000000e+00 : f32
      %142 = vector.broadcast %cst_44 : f32 to vector<8x128xf32>
      %c0_45 = arith.constant 0 : index
      %c0_46 = arith.constant 0 : index
      %143 = vector.load %arg14[%c0_45, %c0_46] : memref<8x128xf32, #tpu.memory_space<vmem>>, vector<8x128xf32>
      tpu.vector_store %arg14[%c0_45, %c0_46], %142 {strides = array<i32>} : memref<8x128xf32, #tpu.memory_space<vmem>>, vector<8x128xf32>,
      %cst_47 = arith.constant 0.000000e+00 : f32
      %144 = vector.broadcast %cst_47 : f32 to vector<8x128xf32>
      %c0_48 = arith.constant 0 : index
      %c0_49 = arith.constant 0 : index
      %145 = vector.load %arg15[%c0_48, %c0_49] : memref<8x128xf32, #tpu.memory_space<vmem>>, vector<8x128xf32>
      tpu.vector_store %arg15[%c0_48, %c0_49], %144 {strides = array<i32>} : memref<8x128xf32, #tpu.memory_space<vmem>>, vector<8x128xf32>,
      %c0_i32_50 = arith.constant 0 : i32
      %146 = tpu.memref_slice %arg16[%c0_i32_50] : memref<5x!tpu.dma_semaphore, #tpu.memory_space<semaphore_mem>> -> memref<1x!tpu.dma_semaphore, #tpu.memory_space<semaphore_mem>>
      %147 = tpu.memref_squeeze %146 : memref<1x!tpu.dma_semaphore, #tpu.memory_space<semaphore_mem>> -> memref<!tpu.dma_semaphore, #tpu.memory_space<semaphore_mem>>
      tpu.enqueue_dma source(%arg2 : memref<16x512xf32, #tpu.memory_space<any>>) target(%arg8 : memref<16x512xf32, #tpu.memory_space<vmem>>) target_semaphore(%147 : memref<!tpu.dma_semaphore, #tpu.memory_space<semaphore_mem>>)
      %c1_i32_51 = arith.constant 1 : i32
      %148 = tpu.memref_slice %arg16[%c1_i32_51] : memref<5x!tpu.dma_semaphore, #tpu.memory_space<semaphore_mem>> -> memref<1x!tpu.dma_semaphore, #tpu.memory_space<semaphore_mem>>
      %149 = tpu.memref_squeeze %148 : memref<1x!tpu.dma_semaphore, #tpu.memory_space<semaphore_mem>> -> memref<!tpu.dma_semaphore, #tpu.memory_space<semaphore_mem>>
      tpu.enqueue_dma source(%arg3 : memref<128x512xf32, #tpu.memory_space<any>>) target(%arg9 : memref<128x512xf32, #tpu.memory_space<vmem>>) target_semaphore(%149 : memref<!tpu.dma_semaphore, #tpu.memory_space<semaphore_mem>>)
      %c2_i32_52 = arith.constant 2 : i32
      %150 = tpu.memref_slice %arg16[%c2_i32_52] : memref<5x!tpu.dma_semaphore, #tpu.memory_space<semaphore_mem>> -> memref<1x!tpu.dma_semaphore, #tpu.memory_space<semaphore_mem>>
      %151 = tpu.memref_squeeze %150 : memref<1x!tpu.dma_semaphore, #tpu.memory_space<semaphore_mem>> -> memref<!tpu.dma_semaphore, #tpu.memory_space<semaphore_mem>>
      tpu.enqueue_dma source(%arg4 : memref<1x512xf32, #tpu.memory_space<any>>) target(%arg10 : memref<1x512xf32, #tpu.memory_space<vmem>>) target_semaphore(%151 : memref<!tpu.dma_semaphore, #tpu.memory_space<semaphore_mem>>)
      %c0_i32_53 = arith.constant 0 : i32
      %152 = tpu.memref_slice %arg16[%c0_i32_53] : memref<5x!tpu.dma_semaphore, #tpu.memory_space<semaphore_mem>> -> memref<1x!tpu.dma_semaphore, #tpu.memory_space<semaphore_mem>>
      %153 = tpu.memref_squeeze %152 : memref<1x!tpu.dma_semaphore, #tpu.memory_space<semaphore_mem>> -> memref<!tpu.dma_semaphore, #tpu.memory_space<semaphore_mem>>
      tpu.wait_dma2 semaphore(%153 : memref<!tpu.dma_semaphore, #tpu.memory_space<semaphore_mem>>) src(%arg2 : memref<16x512xf32, #tpu.memory_space<any>>) dst(%arg8 : memref<16x512xf32, #tpu.memory_space<vmem>>)
      %c1_i32_54 = arith.constant 1 : i32
      %154 = tpu.memref_slice %arg16[%c1_i32_54] : memref<5x!tpu.dma_semaphore, #tpu.memory_space<semaphore_mem>> -> memref<1x!tpu.dma_semaphore, #tpu.memory_space<semaphore_mem>>
      %155 = tpu.memref_squeeze %154 : memref<1x!tpu.dma_semaphore, #tpu.memory_space<semaphore_mem>> -> memref<!tpu.dma_semaphore, #tpu.memory_space<semaphore_mem>>
      tpu.wait_dma2 semaphore(%155 : memref<!tpu.dma_semaphore, #tpu.memory_space<semaphore_mem>>) src(%arg3 : memref<128x512xf32, #tpu.memory_space<any>>) dst(%arg9 : memref<128x512xf32, #tpu.memory_space<vmem>>)
      %c2_i32_55 = arith.constant 2 : i32
      %156 = tpu.memref_slice %arg16[%c2_i32_55] : memref<5x!tpu.dma_semaphore, #tpu.memory_space<semaphore_mem>> -> memref<1x!tpu.dma_semaphore, #tpu.memory_space<semaphore_mem>>
      %157 = tpu.memref_squeeze %156 : memref<1x!tpu.dma_semaphore, #tpu.memory_space<semaphore_mem>> -> memref<!tpu.dma_semaphore, #tpu.memory_space<semaphore_mem>>
      tpu.wait_dma2 semaphore(%157 : memref<!tpu.dma_semaphore, #tpu.memory_space<semaphore_mem>>) src(%arg4 : memref<1x512xf32, #tpu.memory_space<any>>) dst(%arg10 : memref<1x512xf32, #tpu.memory_space<vmem>>)
    } else {
    }
    %c0 = arith.constant 0 : index
    %c0_1 = arith.constant 0 : index
    %3 = vector.load %arg1[%c0, %c0_1] : memref<32x16xf32, #tpu.memory_space<vmem>>, vector<32x16xf32>
    %c0_2 = arith.constant 0 : index
    %c0_3 = arith.constant 0 : index
    %4 = vector.load %arg8[%c0_2, %c0_3] : memref<16x512xf32, #tpu.memory_space<vmem>>, vector<16x512xf32>
    %cst = arith.constant dense<0.000000e+00> : vector<32x512xf32>
    %5 = tpu.matmul %3, %4, %cst {dimension_numbers = #tpu.dot_dimension_numbers<[1], [0], [0], [1], [0, 0, 1, 1], [], []>} : vector<32x16xf32>, vector<16x512xf32>, vector<32x512xf32> -> vector<32x512xf32>
    %c0_4 = arith.constant 0 : index
    %c0_5 = arith.constant 0 : index
    %6 = vector.load %arg10[%c0_4, %c0_5] : memref<1x512xf32, #tpu.memory_space<vmem>>, vector<1x512xf32>
    %7 = vector.broadcast %6 : vector<1x512xf32> to vector<32x512xf32>
    %8 = arith.addf %5, %7 : vector<32x512xf32>
    %c0_6 = arith.constant 0 : index
    %c0_7 = arith.constant 0 : index
    %9 = vector.load %arg13[%c0_6, %c0_7] : memref<32x512xf32, #tpu.memory_space<vmem>>, vector<32x512xf32>
    tpu.vector_store %arg13[%c0_6, %c0_7], %8 {strides = array<i32>} : memref<32x512xf32, #tpu.memory_space<vmem>>, vector<32x512xf32>,
    %c0_8 = arith.constant 0 : index
    %c0_9 = arith.constant 0 : index
    %10 = vector.load %arg9[%c0_8, %c0_9] : memref<128x512xf32, #tpu.memory_space<vmem>>, vector<128x512xf32>
    %c0_10 = arith.constant 0 : index
    %c0_11 = arith.constant 0 : index
    %11 = vector.load %arg14[%c0_10, %c0_11] : memref<8x128xf32, #tpu.memory_space<vmem>>, vector<8x128xf32>
    %c0_12 = arith.constant 0 : index
    %c0_13 = arith.constant 0 : index
    %12 = vector.load %arg15[%c0_12, %c0_13] : memref<8x128xf32, #tpu.memory_space<vmem>>, vector<8x128xf32>
    %c0_i32_14 = arith.constant 0 : i32
    %c8_i32 = arith.constant 8 : i32
    %13 = arith.muli %c0_i32_14, %c8_i32 : i32
    %14 = tpu.assume_multiple %13, 8 : i32
    %15 = arith.index_cast %14 : i32 to index
    %c0_15 = arith.constant 0 : index
    %16 = vector.load %arg13[%15, %c0_15] : memref<32x512xf32, #tpu.memory_space<vmem>>, vector<8x512xf32>
    %cst_16 = arith.constant dense<0.000000e+00> : vector<8x512xf32>
    %17 = tpu.matmul %11, %10, %cst_16 {dimension_numbers = #tpu.dot_dimension_numbers<[1], [0], [0], [1], [0, 0, 1, 1], [], []>} : vector<8x128xf32>, vector<128x512xf32>, vector<8x512xf32> -> vector<8x512xf32>
    %18 = arith.addf %16, %17 : vector<8x512xf32>
    %19 = vector.extract_strided_slice %18 {offsets = [0, 0], sizes = [8, 128], strides = [1, 1]} : vector<8x512xf32> to vector<8x128xf32>
    %20 = arith.negf %19 : vector<8x128xf32>
    %21 = math.exp %20 : vector<8x128xf32>
    %cst_17 = arith.constant 1.000000e+00 : f32
    %22 = vector.broadcast %cst_17 : f32 to vector<8x128xf32>
    %23 = arith.addf %22, %21 : vector<8x128xf32>
    %24 = arith.divf %22, %23 : vector<8x128xf32>
    %25 = vector.extract_strided_slice %18 {offsets = [0, 128], sizes = [8, 128], strides = [1, 1]} : vector<8x512xf32> to vector<8x128xf32>
    %26 = arith.negf %25 : vector<8x128xf32>
    %27 = math.exp %26 : vector<8x128xf32>
    %cst_18 = arith.constant 1.000000e+00 : f32
    %28 = vector.broadcast %cst_18 : f32 to vector<8x128xf32>
    %29 = arith.addf %28, %27 : vector<8x128xf32>
    %30 = arith.divf %28, %29 : vector<8x128xf32>
    %31 = vector.extract_strided_slice %18 {offsets = [0, 256], sizes = [8, 128], strides = [1, 1]} : vector<8x512xf32> to vector<8x128xf32>
    %32 = math.tanh %31 : vector<8x128xf32>
    %33 = vector.extract_strided_slice %18 {offsets = [0, 384], sizes = [8, 128], strides = [1, 1]} : vector<8x512xf32> to vector<8x128xf32>
    %34 = arith.negf %33 : vector<8x128xf32>
    %35 = math.exp %34 : vector<8x128xf32>
    %cst_19 = arith.constant 1.000000e+00 : f32
    %36 = vector.broadcast %cst_19 : f32 to vector<8x128xf32>
    %37 = arith.addf %36, %35 : vector<8x128xf32>
    %38 = arith.divf %36, %37 : vector<8x128xf32>
    %39 = arith.mulf %30, %12 : vector<8x128xf32>
    %40 = arith.mulf %24, %32 : vector<8x128xf32>
    %41 = arith.addf %39, %40 : vector<8x128xf32>
    %42 = math.tanh %41 : vector<8x128xf32>
    %43 = arith.mulf %38, %42 : vector<8x128xf32>
    %c1_i32 = arith.constant 1 : i32
    %c8_i32_20 = arith.constant 8 : i32
    %44 = arith.muli %c1_i32, %c8_i32_20 : i32
    %45 = tpu.assume_multiple %44, 8 : i32
    %46 = arith.index_cast %45 : i32 to index
    %c0_21 = arith.constant 0 : index
    %47 = vector.load %arg13[%46, %c0_21] : memref<32x512xf32, #tpu.memory_space<vmem>>, vector<8x512xf32>
    %cst_22 = arith.constant dense<0.000000e+00> : vector<8x512xf32>
    %48 = tpu.matmul %43, %10, %cst_22 {dimension_numbers = #tpu.dot_dimension_numbers<[1], [0], [0], [1], [0, 0, 1, 1], [], []>} : vector<8x128xf32>, vector<128x512xf32>, vector<8x512xf32> -> vector<8x512xf32>
    %49 = arith.addf %47, %48 : vector<8x512xf32>
    %50 = vector.extract_strided_slice %49 {offsets = [0, 0], sizes = [8, 128], strides = [1, 1]} : vector<8x512xf32> to vector<8x128xf32>
    %51 = arith.negf %50 : vector<8x128xf32>
    %52 = math.exp %51 : vector<8x128xf32>
    %cst_23 = arith.constant 1.000000e+00 : f32
    %53 = vector.broadcast %cst_23 : f32 to vector<8x128xf32>
    %54 = arith.addf %53, %52 : vector<8x128xf32>
    %55 = arith.divf %53, %54 : vector<8x128xf32>
    %56 = vector.extract_strided_slice %49 {offsets = [0, 128], sizes = [8, 128], strides = [1, 1]} : vector<8x512xf32> to vector<8x128xf32>
    %57 = arith.negf %56 : vector<8x128xf32>
    %58 = math.exp %57 : vector<8x128xf32>
    %cst_24 = arith.constant 1.000000e+00 : f32
    %59 = vector.broadcast %cst_24 : f32 to vector<8x128xf32>
    %60 = arith.addf %59, %58 : vector<8x128xf32>
    %61 = arith.divf %59, %60 : vector<8x128xf32>
    %62 = vector.extract_strided_slice %49 {offsets = [0, 256], sizes = [8, 128], strides = [1, 1]} : vector<8x512xf32> to vector<8x128xf32>
    %63 = math.tanh %62 : vector<8x128xf32>
    %64 = vector.extract_strided_slice %49 {offsets = [0, 384], sizes = [8, 128], strides = [1, 1]} : vector<8x512xf32> to vector<8x128xf32>
    %65 = arith.negf %64 : vector<8x128xf32>
    %66 = math.exp %65 : vector<8x128xf32>
    %cst_25 = arith.constant 1.000000e+00 : f32
    %67 = vector.broadcast %cst_25 : f32 to vector<8x128xf32>
    %68 = arith.addf %67, %66 : vector<8x128xf32>
    %69 = arith.divf %67, %68 : vector<8x128xf32>
    %70 = arith.mulf %61, %41 : vector<8x128xf32>
    %71 = arith.mulf %55, %63 : vector<8x128xf32>
    %72 = arith.addf %70, %71 : vector<8x128xf32>
    %73 = math.tanh %72 : vector<8x128xf32>
    %74 = arith.mulf %69, %73 : vector<8x128xf32>
    %c2_i32 = arith.constant 2 : i32
    %c8_i32_26 = arith.constant 8 : i32
    %75 = arith.muli %c2_i32, %c8_i32_26 : i32
    %76 = tpu.assume_multiple %75, 8 : i32
    %77 = arith.index_cast %76 : i32 to index
    %c0_27 = arith.constant 0 : index
    %78 = vector.load %arg13[%77, %c0_27] : memref<32x512xf32, #tpu.memory_space<vmem>>, vector<8x512xf32>
    %cst_28 = arith.constant dense<0.000000e+00> : vector<8x512xf32>
    %79 = tpu.matmul %74, %10, %cst_28 {dimension_numbers = #tpu.dot_dimension_numbers<[1], [0], [0], [1], [0, 0, 1, 1], [], []>} : vector<8x128xf32>, vector<128x512xf32>, vector<8x512xf32> -> vector<8x512xf32>
    %80 = arith.addf %78, %79 : vector<8x512xf32>
    %81 = vector.extract_strided_slice %80 {offsets = [0, 0], sizes = [8, 128], strides = [1, 1]} : vector<8x512xf32> to vector<8x128xf32>
    %82 = arith.negf %81 : vector<8x128xf32>
    %83 = math.exp %82 : vector<8x128xf32>
    %cst_29 = arith.constant 1.000000e+00 : f32
    %84 = vector.broadcast %cst_29 : f32 to vector<8x128xf32>
    %85 = arith.addf %84, %83 : vector<8x128xf32>
    %86 = arith.divf %84, %85 : vector<8x128xf32>
    %87 = vector.extract_strided_slice %80 {offsets = [0, 128], sizes = [8, 128], strides = [1, 1]} : vector<8x512xf32> to vector<8x128xf32>
    %88 = arith.negf %87 : vector<8x128xf32>
    %89 = math.exp %88 : vector<8x128xf32>
    %cst_30 = arith.constant 1.000000e+00 : f32
    %90 = vector.broadcast %cst_30 : f32 to vector<8x128xf32>
    %91 = arith.addf %90, %89 : vector<8x128xf32>
    %92 = arith.divf %90, %91 : vector<8x128xf32>
    %93 = vector.extract_strided_slice %80 {offsets = [0, 256], sizes = [8, 128], strides = [1, 1]} : vector<8x512xf32> to vector<8x128xf32>
    %94 = math.tanh %93 : vector<8x128xf32>
    %95 = vector.extract_strided_slice %80 {offsets = [0, 384], sizes = [8, 128], strides = [1, 1]} : vector<8x512xf32> to vector<8x128xf32>
    %96 = arith.negf %95 : vector<8x128xf32>
    %97 = math.exp %96 : vector<8x128xf32>
    %cst_31 = arith.constant 1.000000e+00 : f32
    %98 = vector.broadcast %cst_31 : f32 to vector<8x128xf32>
    %99 = arith.addf %98, %97 : vector<8x128xf32>
    %100 = arith.divf %98, %99 : vector<8x128xf32>
    %101 = arith.mulf %92, %72 : vector<8x128xf32>
    %102 = arith.mulf %86, %94 : vector<8x128xf32>
    %103 = arith.addf %101, %102 : vector<8x128xf32>
    %104 = math.tanh %103 : vector<8x128xf32>
    %105 = arith.mulf %100, %104 : vector<8x128xf32>
    %c3_i32 = arith.constant 3 : i32
    %c8_i32_32 = arith.constant 8 : i32
    %106 = arith.muli %c3_i32, %c8_i32_32 : i32
    %107 = tpu.assume_multiple %106, 8 : i32
    %108 = arith.index_cast %107 : i32 to index
    %c0_33 = arith.constant 0 : index
    %109 = vector.load %arg13[%108, %c0_33] : memref<32x512xf32, #tpu.memory_space<vmem>>, vector<8x512xf32>
    %cst_34 = arith.constant dense<0.000000e+00> : vector<8x512xf32>
    %110 = tpu.matmul %105, %10, %cst_34 {dimension_numbers = #tpu.dot_dimension_numbers<[1], [0], [0], [1], [0, 0, 1, 1], [], []>} : vector<8x128xf32>, vector<128x512xf32>, vector<8x512xf32> -> vector<8x512xf32>
    %111 = arith.addf %109, %110 : vector<8x512xf32>
    %112 = vector.extract_strided_slice %111 {offsets = [0, 0], sizes = [8, 128], strides = [1, 1]} : vector<8x512xf32> to vector<8x128xf32>
    %113 = arith.negf %112 : vector<8x128xf32>
    %114 = math.exp %113 : vector<8x128xf32>
    %cst_35 = arith.constant 1.000000e+00 : f32
    %115 = vector.broadcast %cst_35 : f32 to vector<8x128xf32>
    %116 = arith.addf %115, %114 : vector<8x128xf32>
    %117 = arith.divf %115, %116 : vector<8x128xf32>
    %118 = vector.extract_strided_slice %111 {offsets = [0, 128], sizes = [8, 128], strides = [1, 1]} : vector<8x512xf32> to vector<8x128xf32>
    %119 = arith.negf %118 : vector<8x128xf32>
    %120 = math.exp %119 : vector<8x128xf32>
    %cst_36 = arith.constant 1.000000e+00 : f32
    %121 = vector.broadcast %cst_36 : f32 to vector<8x128xf32>
    %122 = arith.addf %121, %120 : vector<8x128xf32>
    %123 = arith.divf %121, %122 : vector<8x128xf32>
    %124 = vector.extract_strided_slice %111 {offsets = [0, 256], sizes = [8, 128], strides = [1, 1]} : vector<8x512xf32> to vector<8x128xf32>
    %125 = math.tanh %124 : vector<8x128xf32>
    %126 = vector.extract_strided_slice %111 {offsets = [0, 384], sizes = [8, 128], strides = [1, 1]} : vector<8x512xf32> to vector<8x128xf32>
    %127 = arith.negf %126 : vector<8x128xf32>
    %128 = math.exp %127 : vector<8x128xf32>
    %cst_37 = arith.constant 1.000000e+00 : f32
    %129 = vector.broadcast %cst_37 : f32 to vector<8x128xf32>
    %130 = arith.addf %129, %128 : vector<8x128xf32>
    %131 = arith.divf %129, %130 : vector<8x128xf32>
    %132 = arith.mulf %123, %103 : vector<8x128xf32>
    %133 = arith.mulf %117, %125 : vector<8x128xf32>
    %134 = arith.addf %132, %133 : vector<8x128xf32>
    %135 = math.tanh %134 : vector<8x128xf32>
    %136 = arith.mulf %131, %135 : vector<8x128xf32>
    %c4_i32 = arith.constant 4 : i32
    %c0_38 = arith.constant 0 : index
    %c0_39 = arith.constant 0 : index
    %137 = vector.load %arg14[%c0_38, %c0_39] : memref<8x128xf32, #tpu.memory_space<vmem>>, vector<8x128xf32>
    tpu.vector_store %arg14[%c0_38, %c0_39], %136 {strides = array<i32>} : memref<8x128xf32, #tpu.memory_space<vmem>>, vector<8x128xf32>,
    %c0_40 = arith.constant 0 : index
    %c0_41 = arith.constant 0 : index
    %138 = vector.load %arg15[%c0_40, %c0_41] : memref<8x128xf32, #tpu.memory_space<vmem>>, vector<8x128xf32>
    tpu.vector_store %arg15[%c0_40, %c0_41], %134 {strides = array<i32>} : memref<8x128xf32, #tpu.memory_space<vmem>>, vector<8x128xf32>,
    %c1_i32_42 = arith.constant 1 : i32
    %139 = arith.cmpi eq, %arg0, %c1_i32_42 : i32
    %140 = arith.extui %139 : i1 to i32
    %c0_i32_43 = arith.constant 0 : i32
    %141 = arith.cmpi ne, %140, %c0_i32_43 : i32
    scf.if %141 {
      %c3_i32_44 = arith.constant 3 : i32
      %142 = tpu.memref_slice %arg16[%c3_i32_44] : memref<5x!tpu.dma_semaphore, #tpu.memory_space<semaphore_mem>> -> memref<1x!tpu.dma_semaphore, #tpu.memory_space<semaphore_mem>>
      %143 = tpu.memref_squeeze %142 : memref<1x!tpu.dma_semaphore, #tpu.memory_space<semaphore_mem>> -> memref<!tpu.dma_semaphore, #tpu.memory_space<semaphore_mem>>
      tpu.enqueue_dma source(%arg5 : memref<128x4xf32, #tpu.memory_space<any>>) target(%arg11 : memref<128x4xf32, #tpu.memory_space<vmem>>) target_semaphore(%143 : memref<!tpu.dma_semaphore, #tpu.memory_space<semaphore_mem>>)
      %c4_i32_45 = arith.constant 4 : i32
      %144 = tpu.memref_slice %arg16[%c4_i32_45] : memref<5x!tpu.dma_semaphore, #tpu.memory_space<semaphore_mem>> -> memref<1x!tpu.dma_semaphore, #tpu.memory_space<semaphore_mem>>
      %145 = tpu.memref_squeeze %144 : memref<1x!tpu.dma_semaphore, #tpu.memory_space<semaphore_mem>> -> memref<!tpu.dma_semaphore, #tpu.memory_space<semaphore_mem>>
      tpu.enqueue_dma source(%arg6 : memref<1x4xf32, #tpu.memory_space<any>>) target(%arg12 : memref<1x4xf32, #tpu.memory_space<vmem>>) target_semaphore(%145 : memref<!tpu.dma_semaphore, #tpu.memory_space<semaphore_mem>>)
      %c3_i32_46 = arith.constant 3 : i32
      %146 = tpu.memref_slice %arg16[%c3_i32_46] : memref<5x!tpu.dma_semaphore, #tpu.memory_space<semaphore_mem>> -> memref<1x!tpu.dma_semaphore, #tpu.memory_space<semaphore_mem>>
      %147 = tpu.memref_squeeze %146 : memref<1x!tpu.dma_semaphore, #tpu.memory_space<semaphore_mem>> -> memref<!tpu.dma_semaphore, #tpu.memory_space<semaphore_mem>>
      tpu.wait_dma2 semaphore(%147 : memref<!tpu.dma_semaphore, #tpu.memory_space<semaphore_mem>>) src(%arg5 : memref<128x4xf32, #tpu.memory_space<any>>) dst(%arg11 : memref<128x4xf32, #tpu.memory_space<vmem>>)
      %c4_i32_47 = arith.constant 4 : i32
      %148 = tpu.memref_slice %arg16[%c4_i32_47] : memref<5x!tpu.dma_semaphore, #tpu.memory_space<semaphore_mem>> -> memref<1x!tpu.dma_semaphore, #tpu.memory_space<semaphore_mem>>
      %149 = tpu.memref_squeeze %148 : memref<1x!tpu.dma_semaphore, #tpu.memory_space<semaphore_mem>> -> memref<!tpu.dma_semaphore, #tpu.memory_space<semaphore_mem>>
      tpu.wait_dma2 semaphore(%149 : memref<!tpu.dma_semaphore, #tpu.memory_space<semaphore_mem>>) src(%arg6 : memref<1x4xf32, #tpu.memory_space<any>>) dst(%arg12 : memref<1x4xf32, #tpu.memory_space<vmem>>)
      %c0_48 = arith.constant 0 : index
      %c0_49 = arith.constant 0 : index
      %150 = vector.load %arg11[%c0_48, %c0_49] : memref<128x4xf32, #tpu.memory_space<vmem>>, vector<128x4xf32>
      %cst_50 = arith.constant dense<0.000000e+00> : vector<8x4xf32>
      %151 = tpu.matmul %136, %150, %cst_50 {dimension_numbers = #tpu.dot_dimension_numbers<[1], [0], [0], [1], [0, 0, 1, 1], [], []>} : vector<8x128xf32>, vector<128x4xf32>, vector<8x4xf32> -> vector<8x4xf32>
      %c0_51 = arith.constant 0 : index
      %c0_52 = arith.constant 0 : index
      %152 = vector.load %arg12[%c0_51, %c0_52] : memref<1x4xf32, #tpu.memory_space<vmem>>, vector<1x4xf32>
      %153 = vector.broadcast %152 : vector<1x4xf32> to vector<8x4xf32>
      %154 = arith.addf %151, %153 : vector<8x4xf32>
      %c0_53 = arith.constant 0 : index
      %c0_54 = arith.constant 0 : index
      %155 = vector.load %arg7[%c0_53, %c0_54] : memref<8x4xf32, #tpu.memory_space<vmem>>, vector<8x4xf32>
      tpu.vector_store %arg7[%c0_53, %c0_54], %154 {strides = array<i32>} : memref<8x4xf32, #tpu.memory_space<vmem>>, vector<8x4xf32>,
    } else {
    }
    return
  }
  func.func @transform_0(%arg0: i32) -> (i32, i32) {
    %c0_i32 = arith.constant 0 : i32
    %c0_i32_0 = arith.constant 0 : i32
    return %arg0, %c0_i32 : i32, i32
  }
  func.func @transform_6(%arg0: i32) -> (i32, i32) {
    %c0_i32 = arith.constant 0 : i32
    %c0_i32_0 = arith.constant 0 : i32
    %c0_i32_1 = arith.constant 0 : i32
    return %c0_i32, %c0_i32_0 : i32, i32
  }
}

</mosaic_0001>

<bundles_post_ra>
// kernel: tpu_custom_call.1
= control target key start
LH: loop header
LB: loop body
LE: loop exit
PB: predicated region body
PF: predicated region fallthrough
CT: control target
= control target key end

     0   :  { %s1829_s21 = smov 0   ;;  %s2390_s0 = inlined_call_operand.vmem [shape: f32[64,16], index: 0, kind: input, shape index: {}]   ;;  %s2391_s1 = inlined_call_operand.vmem [shape: f32[16,512], index: 1, kind: input, shape index: {}]   ;;  %s2392_s2 = inlined_call_operand.hbm [shape: f32[128,512], index: 2, kind: input, shape index: {}]   ;;  %s2393_s3 = inlined_call_operand.vmem [shape: f32[1,512], index: 3, kind: input, shape index: {}]   ;;  %s2394_s4 = inlined_call_operand.vmem [shape: f32[128,4], index: 4, kind: input, shape index: {}]   ;;  %s2395_s5 = inlined_call_operand.vmem [shape: f32[1,4], index: 5, kind: input, shape index: {}]   ;;  %s2396_s6 = inlined_call_operand.vmem [shape: f32[8,4], index: 6, kind: output, shape index: {}]  }
   0x1 LB: > { %s1835_s22 = sadd.s32 4294967295, %s1787_s21   ;;  %p1589_p0 = scmp.ge.s32.totalorder %s1787_s21, 1  ;;  %s1787_s21 = sphi %s1829_s21, %s16_s21  }
   0x2   : > { %p88_p1 = scmp.lt.s32.totalorder %s1787_s21, 3 }
   0x4   : > { %p89_p2 = pnand %p1589_p0, %p88_p1 }
   0x6   : > { %92 = sbr.rel (%p89_p2) target bundleno = 1326 (0x52e), region = 24 }
   0xb   : > { %s1590_s23 = sshll.u32 %s1835_s22, 2  ;;  %p1592_p4 = scmp.ne.s32.totalorder %s1835_s22, 0 }
   0xc   : > { %p104_p3 = scmp.lt.s32.totalorder %s1590_s23, 7 }
   0xd   : > { %112 = sbr.rel (%p1592_p4) target bundleno = 42 (0x2a), region = 28 }
   0xe   : > { %s2551_s23 = smov (!%p104_p3, %s1590_s23), 7 }
   0xf   : > { %s1591_s24 = sshll.u32 %s2551_s23, 3 }
  0x10   : > { %s1843_s27 = scalar_lea.vmem %s2390_s0, %s1591_s24 }
  0x12   : > { %v148_v0 = vld [vmem:[%s2391_s1] sm:$0xff]  ;;  %v150_v1 = vld [vmem:[%s2391_s1 + $0x8] sm:$0xff]  ;;  %v152_v2 = vld [vmem:[%s2391_s1 + $0x10] sm:$0xff]  ;;  %v1789_v3 = vmov 0.0  }
  0x13   : > { %113 = vst [vmem:[#allocation8] sm:$0xff] %v1789_v3  ;;  %114 = vst [vmem:[#allocation9] sm:$0xff] %v1789_v3  ;;  %v154_v4 = vld [vmem:[%s2391_s1 + $0x18] sm:$0xff]  ;;  %v156_v5 = vld [vmem:[%s2391_s1 + $0x20] sm:$0xff] }
  0x14   : > { %149 = vst [vmem:[#allocation2 + $0x30] sm:$0xff] %v148_v0  ;;  %151 = vst [vmem:[#allocation2] sm:$0xff] %v150_v1  ;;  %v158_v6 = vld [vmem:[%s2391_s1 + $0x28] sm:$0xff]  ;;  %v160_v7 = vld [vmem:[%s2391_s1 + $0x30] sm:$0xff] }
  0x15   : > { %153 = vst [vmem:[#allocation2 + $0x18] sm:$0xff] %v152_v2  ;;  %155 = vst [vmem:[#allocation2 + $0x10] sm:$0xff] %v154_v4  ;;  %v162_v8 = vld [vmem:[%s2391_s1 + $0x38] sm:$0xff] }
  0x16   : > { %157 = vst [vmem:[#allocation2 + $0x8] sm:$0xff] %v156_v5  ;;  %159 = vst [vmem:[#allocation2 + $0x20] sm:$0xff] %v158_v6 }
  0x17   : > { %161 = vst [vmem:[#allocation2 + $0x28] sm:$0xff] %v160_v7  ;;  %163 = vst [vmem:[#allocation2 + $0x38] sm:$0xff] %v162_v8 }
  0x18   : > { %171 = vsyncadd [#allocation10], 1024  ;;  %v203_v9 = vld [vmem:[%s2393_s3] sm:$0xf]  ;;  %s1790_s24 = smov [#allocation3]  }
  0x19   : > { %s180_s25 = sshll.u32 %s1790_s24, 4  ;;  %204 = vst [vmem:[#allocation4] sm:$0xf] %v203_v9  ;;  %s181_s25 = int_to_ptr.vmem [resolvable:$true] %s180_s25 }
  0x1a   : > { %s1759_s26 = scalar_lea.vmem %s181_s25, 8192  ;;  %p1764_p6 = scmp.lt.s32.totalorder %s181_s25, %s181_s25 }
  0x1b   : > { %p1760_p5 = scmp.ne.s32.totalorder %s181_s25, %s1759_s26  ;;  %p1765_p7 = scmp.lt.s32.totalorder %s1759_s26, %s1759_s26 }
  0x1d   : > { %p1766_p8 = por %p1765_p7, %p1764_p6 }
  0x1f   : > { %p1767_p9 = pnand %p1766_p8, %p1760_p5 }
  0x21   : > { %1770 = shalt.err (!%p1767_p9)  }
  0x22   : > { %183 = dma.hbm_to_vmem [thread:$0]  %s2392_s2, 8192, %s181_s25, [#allocation10 + $0x1] }
  0x23   : > { %230 = vsyncadd [#allocation10 + $0x2], 64 }
  0x24   : > { %1775 = dma.done.wait [#allocation10], 1024 }
  0x25   : > { %1776 = vsyncadd [#allocation10], 4294966272 }
  0x26   : > { %1777 = dma.done.wait [#allocation10 + $0x1], 8192 }
  0x27   : > { %1778 = vsyncadd [#allocation10 + $0x1], 4294959104 }
  0x28   : > { %1779 = dma.done.wait [#allocation10 + $0x2], 64 }
  0x29   : > { %1780 = vsyncadd [#allocation10 + $0x2], 4294967232 }
  0x2a PF: > { %v251_v10 = vld [vmem:[#allocation2 + $0x20] sm:$0xff]  ;;  %v253_v11 = vld [vmem:[#allocation2 + $0x38] sm:$0xff]  ;;  %v250_v12 = vld [vmem:[#allocation2 + $0x8] sm:$0xff]  ;;  %vm276_vm0 = vcmask 130048   ;;  %v2399_v20 = vmov 0.0   ;;  %p1613_p10 = scmp.ne.s32.totalorder %s1835_s22, 1 }
  0x2b   : > { %317 = vmatprep.subr.mxu0 %v251_v10  ;;  %406 = vmatprep.subr.mxu1 %v253_v11  ;;  %v252_v13 = vld [vmem:[#allocation2 + $0x28] sm:$0xff]  ;;  %v247_v14 = vld [vmem:[#allocation2] sm:$0xff]  ;;  %v249_v15 = vld [vmem:[#allocation2 + $0x10] sm:$0xff] }
  0x2c   : > { %318 = vmatpush1.msra.mxu0 %v250_v12  ;;  %407 = vmatpush1.msra.mxu1 %v252_v13  ;;  %v246_v16 = vld [vmem:[#allocation2 + $0x30] sm:$0xff]  ;;  %v248_v17 = vld [vmem:[#allocation2 + $0x18] sm:$0xff]  ;;  %v242_v18 = vld [vmem:[%s1843_s27] sm:$0xff] }
  0x2d   : > { %319 = vmatprep.subr.mxu0 %v247_v14  ;;  %408 = vmatprep.subr.mxu1 %v249_v15  ;;  %v1877_v19 = vld [vmem:[#allocation3 + $0x1e8] sm:$0xff]  ;;  %v1880_v21 = vld [vmem:[#allocation3 + $0x1f8] sm:$0xff]  ;;  %v1883_v22 = vld [vmem:[#allocation3 + $0x1e0] sm:$0xff] }
  0x2e   : > { %2451 = vst [vmem:[#allocation24_spill] sm:$0xff] %v1877_v19  ;;  %320 = vmatpush1.msra.mxu0 %v246_v16  ;;  %353 = vmatprep.mubr.f32.mxu0 %v2399_v20  ;;  %2452 = vst [vmem:[#allocation25_spill] sm:$0xff] %v1880_v21  ;;  %v1885_v23 = vld [vmem:[#allocation3 + $0x1f0] sm:$0xff]  ;;  %v1889_v24 = vld [vmem:[#allocation3 + $0x1c8] sm:$0xff] }
  0x2f   : > { %409 = vmatpush1.msra.mxu1 %v248_v17  ;;  %1593 = vmatmul.mubr.msk.f32.vlgmr.msra.gmra.mxu0 %vm276_vm0, %v242_v18  ;;  %v1891_v25 = vld [vmem:[#allocation3 + $0x1d8] sm:$0xff]  ;;  %v1895_v26 = vld [vmem:[#allocation3 + $0x1c0] sm:$0xff]  ;;  %v1897_v27 = vld [vmem:[#allocation3 + $0x1d0] sm:$0xff] }
  0x30   : > { %442 = vmatprep.mubr.f32.mxu1 %v2399_v20  ;;  %556 = vmatprep.subr.mxu0 %v1877_v19  ;;  %v1901_v28 = vld [vmem:[#allocation3 + $0x1a8] sm:$0xff]  ;;  %v1903_v29 = vld [vmem:[#allocation3 + $0x1b8] sm:$0xff]  ;;  %v1907_v30 = vld [vmem:[#allocation3 + $0x1a0] sm:$0xff] }
  0x31   : > { %627 = vmatprep.subr.mxu1 %v1880_v21  ;;  %1597 = vmatmul.mubr.msk.f32.vlgmr.msra.gmra.mxu1 %vm276_vm0, %v242_v18  ;;  %v1909_v31 = vld [vmem:[#allocation3 + $0x1b0] sm:$0xff]  ;;  %v1913_v32 = vld [vmem:[#allocation3 + $0x188] sm:$0xff]  ;;  %v1915_v33 = vld [vmem:[#allocation3 + $0x198] sm:$0xff] }
  0x32   : > { %557 = vmatpush1.msra.mxu0 %v1883_v22  ;;  %628 = vmatpush1.msra.mxu1 %v1885_v23  ;;  %v1919_v34 = vld [vmem:[#allocation3 + $0x180] sm:$0xff]  ;;  %v1921_v35 = vld [vmem:[#allocation3 + $0x190] sm:$0xff]  ;;  %v1925_v36 = vld [vmem:[#allocation3 + $0x168] sm:$0xff] }
  0x33   : > { %558 = vmatprep.subr.mxu0 %v1889_v24  ;;  %629 = vmatprep.subr.mxu1 %v1891_v25  ;;  %v1927_v37 = vld [vmem:[#allocation3 + $0x178] sm:$0xff]  ;;  %v1931_v38 = vld [vmem:[#allocation3 + $0x160] sm:$0xff]  ;;  %v1933_v39 = vld [vmem:[#allocation3 + $0x170] sm:$0xff] }
  0x34   : > { %559 = vmatpush1.msra.mxu0 %v1895_v26  ;;  %630 = vmatpush1.msra.mxu1 %v1897_v27  ;;  %v1937_v40 = vld [vmem:[#allocation3 + $0x148] sm:$0xff]  ;;  %v1939_v41 = vld [vmem:[#allocation3 + $0x158] sm:$0xff]  ;;  %v1943_v42 = vld [vmem:[#allocation3 + $0x140] sm:$0xff] }
  0x35   : > { %560 = vmatprep.subr.mxu0 %v1901_v28  ;;  %631 = vmatprep.subr.mxu1 %v1903_v29  ;;  %v1945_v43 = vld [vmem:[#allocation3 + $0x150] sm:$0xff]  ;;  %v1949_v44 = vld [vmem:[#allocation3 + $0x128] sm:$0xff]  ;;  %v1951_v45 = vld [vmem:[#allocation3 + $0x138] sm:$0xff] }
  0x36   : > { %561 = vmatpush1.msra.mxu0 %v1907_v30  ;;  %632 = vmatpush1.msra.mxu1 %v1909_v31  ;;  %v1955_v46 = vld [vmem:[#allocation3 + $0x120] sm:$0xff]  ;;  %v1957_v47 = vld [vmem:[#allocation3 + $0x130] sm:$0xff]  ;;  %v1961_v48 = vld [vmem:[#allocation3 + $0x108] sm:$0xff] }
  0x37   : > { %562 = vmatprep.subr.mxu0 %v1913_v32  ;;  %633 = vmatprep.subr.mxu1 %v1915_v33  ;;  %v1963_v49 = vld [vmem:[#allocation3 + $0x118] sm:$0xff]  ;;  %v1967_v50 = vld [vmem:[#allocation3 + $0x100] sm:$0xff]  ;;  %v1969_v51 = vld [vmem:[#allocation3 + $0x110] sm:$0xff] }
  0x38   : > { %563 = vmatpush1.msra.mxu0 %v1919_v34  ;;  %634 = vmatpush1.msra.mxu1 %v1921_v35  ;;  %v1973_v52 = vld [vmem:[#allocation3 + $0xe8] sm:$0xff]  ;;  %v1975_v53 = vld [vmem:[#allocation3 + $0xf8] sm:$0xff]  ;;  %v1979_v54 = vld [vmem:[#allocation3 + $0xe0] sm:$0xff] }
  0x39   : > { %564 = vmatprep.subr.mxu0 %v1925_v36  ;;  %635 = vmatprep.subr.mxu1 %v1927_v37  ;;  %v1983_v55 = vld [vmem:[#allocation3 + $0xf0] sm:$0xff]  ;;  %v243_v56 = vld [vmem:[%s1843_s27 + $0x8] sm:$0xff]  ;;  %v1990_v58 = vld [vmem:[#allocation3 + $0xd8] sm:$0xff] }
  0x3a   : > { %565 = vmatpush1.msra.mxu0 %v1931_v38  ;;  %636 = vmatpush1.msra.mxu1 %v1933_v39  ;;  %v1988_v57 = vld [vmem:[#allocation3 + $0xc8] sm:$0xff]  ;;  %v1994_v59 = vld [vmem:[#allocation3 + $0xc0] sm:$0xff]  ;;  %v1998_v60 = vld [vmem:[#allocation3 + $0xd0] sm:$0xff] }
  0x3b   : > { %566 = vmatprep.subr.mxu0 %v1937_v40  ;;  %637 = vmatprep.subr.mxu1 %v1939_v41  ;;  %v2000_v61 = vld [vmem:[#allocation3 + $0xa8] sm:$0xff]  ;;  %v2004_v62 = vld [vmem:[#allocation3 + $0xb8] sm:$0xff]  ;;  %v2008_v63 = vld [vmem:[#allocation3 + $0xa0] sm:$0xff] }
  0x3c   : > { %567 = vmatpush1.msra.mxu0 %v1943_v42  ;;  %638 = vmatpush1.msra.mxu1 %v1945_v43  ;;  %2453 = vst [vmem:[#allocation26_spill] sm:$0xff] %v2000_v61  ;;  %2454 = vst [vmem:[#allocation27_spill] sm:$0xff] %v2004_v62  ;;  %v2012_v0 = vld [vmem:[#allocation3 + $0xb0] sm:$0xff]  ;;  %v2017_v2 = vld [vmem:[#allocation3 + $0x88] sm:$0xff] }
  0x3d   : > { %568 = vmatprep.subr.mxu0 %v1949_v44  ;;  %639 = vmatprep.subr.mxu1 %v1951_v45  ;;  %2455 = vst [vmem:[#allocation28_spill] sm:$0xff] %v2008_v63  ;;  %2456 = vst [vmem:[#allocation29_spill] sm:$0xff] %v2012_v0  ;;  %v244_v1 = vld [vmem:[%s1843_s27 + $0x10] sm:$0xff]  ;;  %v2019_v3 = vld [vmem:[#allocation3 + $0x98] sm:$0xff] }
  0x3e   : > { %569 = vmatpush1.msra.mxu0 %v1955_v46  ;;  %640 = vmatpush1.msra.mxu1 %v1957_v47  ;;  %2457 = vst [vmem:[#allocation30_spill] sm:$0xff] %v2017_v2  ;;  %2458 = vst [vmem:[#allocation31_spill] sm:$0xff] %v2019_v3  ;;  %v2023_v4 = vld [vmem:[#allocation3 + $0x80] sm:$0xff]  ;;  %v2027_v5 = vld [vmem:[#allocation3 + $0x90] sm:$0xff] }
  0x3f   : > { %570 = vmatprep.subr.mxu0 %v1961_v48  ;;  %641 = vmatprep.subr.mxu1 %v1963_v49  ;;  %2459 = vst [vmem:[#allocation32_spill] sm:$0xff] %v2023_v4  ;;  %2460 = vst [vmem:[#allocation33_spill] sm:$0xff] %v2027_v5  ;;  %v2029_v6 = vld [vmem:[#allocation3 + $0x68] sm:$0xff]  ;;  %v2033_v7 = vld [vmem:[#allocation3 + $0x78] sm:$0xff] }
  0x40   : > { %571 = vmatpush1.msra.mxu0 %v1967_v50  ;;  %642 = vmatpush1.msra.mxu1 %v1969_v51  ;;  %2461 = vst [vmem:[#allocation34_spill] sm:$0xff] %v2029_v6  ;;  %2462 = vst [vmem:[#allocation35_spill] sm:$0xff] %v2033_v7  ;;  %v2037_v8 = vld [vmem:[#allocation3 + $0x60] sm:$0xff]  ;;  %v2041_v9 = vld [vmem:[#allocation3 + $0x70] sm:$0xff] }
  0x41   : > { %572 = vmatprep.subr.mxu0 %v1973_v52  ;;  %643 = vmatprep.subr.mxu1 %v1975_v53  ;;  %2463 = vst [vmem:[#allocation36_spill] sm:$0xff] %v2037_v8  ;;  %2464 = vst [vmem:[#allocation37_spill] sm:$0xff] %v2041_v9  ;;  %v245_v10 = vld [vmem:[%s1843_s27 + $0x18] sm:$0xff]  ;;  %v2046_v11 = vld [vmem:[#allocation3 + $0x48] sm:$0xff] }
  0x42   : > { %359 = vmatprep.mubr.f32.mxu0 %v2399_v20  ;;  %573 = vmatpush1.msra.mxu0 %v1979_v54  ;;  %2465 = vst [vmem:[#allocation38_spill] sm:$0xff] %v2046_v11  ;;  %v2048_v12 = vld [vmem:[#allocation3 + $0x58] sm:$0xff]  ;;  %v2052_v13 = vld [vmem:[#allocation3 + $0x40] sm:$0xff]  ;;  %v2056_v14 = vld [vmem:[#allocation3 + $0x50] sm:$0xff] }
  0x43   : > { %644 = vmatpush1.msra.mxu1 %v1983_v55  ;;  %1594 = vmatmul.mubr.msk.f32.gmra.mxu0 %vm276_vm0, %v243_v56  ;;  %2466 = vst [vmem:[#allocation39_spill] sm:$0xff] %v2048_v12  ;;  %2467 = vst [vmem:[#allocation40_spill] sm:$0xff] %v2052_v13  ;;  %v2058_v15 = vld [vmem:[#allocation3 + $0x28] sm:$0xff]  ;;  %v2062_v16 = vld [vmem:[#allocation3 + $0x38] sm:$0xff] }
  0x44   : > { %574 = vmatprep.subr.mxu0 %v1988_v57  ;;  %645 = vmatprep.subr.mxu1 %v1990_v58  ;;  %2468 = vst [vmem:[#allocation41_spill] sm:$0xff] %v2056_v14  ;;  %2469 = vst [vmem:[#allocation42_spill] sm:$0xff] %v2058_v15  ;;  %v2066_v17 = vld [vmem:[#allocation3 + $0x20] sm:$0xff]  ;;  %v2068_v18 = vld [vmem:[#allocation3 + $0x30] sm:$0xff] }
  0x45   : > { %448 = vmatprep.mubr.f32.mxu1 %v2399_v20  ;;  %575 = vmatpush1.msra.mxu0 %v1994_v59  ;;  %2470 = vst [vmem:[#allocation43_spill] sm:$0xff] %v2062_v16  ;;  %2471 = vst [vmem:[#allocation44_spill] sm:$0xff] %v2066_v17 }
  0x46   : > { %646 = vmatpush1.msra.mxu1 %v1998_v60  ;;  %576 = vmatprep.subr.mxu0 %v2000_v61  ;;  %2472 = vst [vmem:[#allocation45_spill] sm:$0xff] %v2068_v18 }
  0x47   : > { %1598 = vmatmul.mubr.msk.f32.gmra.mxu1 %vm276_vm0, %v243_v56  ;;  %647 = vmatprep.subr.mxu1 %v2004_v62  ;;  %v2072_v56 = vld [vmem:[#allocation3 + $0x8] sm:$0xff] }
  0x48   : > { %365 = vmatprep.mubr.f32.mxu0 %v2399_v20  ;;  %577 = vmatpush1.msra.mxu0 %v2008_v63  ;;  %2473 = vst [vmem:[#allocation46_spill] sm:$0xff] %v2072_v56 }
  0x49   : > { %648 = vmatpush1.msra.mxu1 %v2012_v0  ;;  %1595 = vmatmul.mubr.msk.f32.gmra.mxu0 %vm276_vm0, %v244_v1 }
  0x4a   : > { %578 = vmatprep.subr.mxu0 %v2017_v2  ;;  %649 = vmatprep.subr.mxu1 %v2019_v3 }
  0x4b   : > { %454 = vmatprep.mubr.f32.mxu1 %v2399_v20  ;;  %579 = vmatpush1.msra.mxu0 %v2023_v4 }
  0x4c   : > { %650 = vmatpush1.msra.mxu1 %v2027_v5  ;;  %580 = vmatprep.subr.mxu0 %v2029_v6 }
  0x4d   : > { %1599 = vmatmul.mubr.msk.f32.gmra.mxu1 %vm276_vm0, %v244_v1  ;;  %651 = vmatprep.subr.mxu1 %v2033_v7  ;;  %v2074_v1 = vld [vmem:[#allocation3 + $0x18] sm:$0xff] }
  0x4e   : > { %371 = vmatprep.mubr.f32.mxu0 %v2399_v20  ;;  %581 = vmatpush1.msra.mxu0 %v2037_v8  ;;  %2474 = vst [vmem:[#allocation47_spill] sm:$0xff] %v2074_v1 }
  0x4f   : > { %652 = vmatpush1.msra.mxu1 %v2041_v9  ;;  %1596 = vmatmul.mubr.msk.f32.gmra.mxu0 %vm276_vm0, %v245_v10 }
  0x50   : > { %582 = vmatprep.subr.mxu0 %v2046_v11  ;;  %653 = vmatprep.subr.mxu1 %v2048_v12  ;;  %v2078_v12 = vld [vmem:[#allocation3] sm:$0xff] }
  0x51   : > { %460 = vmatprep.mubr.f32.mxu1 %v2399_v20  ;;  %583 = vmatpush1.msra.mxu0 %v2052_v13  ;;  %2475 = vst [vmem:[#allocation48_spill] sm:$0xff] %v2078_v12  ;;  %v2082_v20 = vld [vmem:[#allocation3 + $0x10] sm:$0xff] }
  0x52   : > { %654 = vmatpush1.msra.mxu1 %v2056_v14  ;;  %584 = vmatprep.subr.mxu0 %v2058_v15  ;;  %2476 = vst [vmem:[#allocation49_spill] sm:$0xff] %v2082_v20  ;;  %v547_v15 = vld [vmem:[#allocation8] sm:$0xff]  ;;  %v2477_v14 = vmov 0.0  }
  0x53   : > { %1600 = vmatmul.mubr.msk.f32.gmra.mxu1 %vm276_vm0, %v245_v10  ;;  %655 = vmatprep.subr.mxu1 %v2062_v16  ;;  %v2478_v10 = vld [vmem:[#allocation39_spill] sm:$0xff] }
  0x54   : > { %585 = vmatpush1.msra.mxu0 %v2066_v17  ;;  %656 = vmatpush1.msra.mxu1 %v2068_v18 }
  0x55   : > { %586 = vmatprep.subr.mxu0 %v2072_v56  ;;  %657 = vmatprep.subr.mxu1 %v2074_v1 }
  0x56   : > { %587 = vmatpush1.msra.mxu0 %v2078_v12  ;;  %620 = vmatprep.mubr.f32.mxu0 %v2477_v14 }
  0x57   : > { %658 = vmatpush1.msra.mxu1 %v2082_v20  ;;  %691 = vmatprep.mubr.f32.mxu1 %v2477_v14 }
  0x58   : > { %621 = vmatmul.mubr.f32.vlgmr.msra.gmra.mxu0 %v547_v15  ;;  %692 = vmatmul.mubr.f32.vlgmr.msra.gmra.mxu1 %v547_v15  ;;  %v2479_v15 = vld [vmem:[#allocation41_spill] sm:$0xff] }
  0x59   : > { %733 = vmatprep.subr.mxu0 %v1877_v19  ;;  %804 = vmatprep.subr.mxu1 %v1880_v21 }
  0x5a   : > { %734 = vmatpush1.msra.mxu0 %v1883_v22  ;;  %805 = vmatpush1.msra.mxu1 %v1885_v23 }
  0x5b   : > { %735 = vmatprep.subr.mxu0 %v1889_v24  ;;  %806 = vmatprep.subr.mxu1 %v1891_v25 }
  0x5c   : > { %736 = vmatpush1.msra.mxu0 %v1895_v26  ;;  %807 = vmatpush1.msra.mxu1 %v1897_v27 }
  0x5d   : > { %737 = vmatprep.subr.mxu0 %v1901_v28  ;;  %808 = vmatprep.subr.mxu1 %v1903_v29 }
  0x5e   : > { %738 = vmatpush1.msra.mxu0 %v1907_v30  ;;  %809 = vmatpush1.msra.mxu1 %v1909_v31 }
  0x5f   : > { %739 = vmatprep.subr.mxu0 %v1913_v32  ;;  %810 = vmatprep.subr.mxu1 %v1915_v33 }
  0x60   : > { %740 = vmatpush1.msra.mxu0 %v1919_v34  ;;  %811 = vmatpush1.msra.mxu1 %v1921_v35 }
  0x61   : > { %741 = vmatprep.subr.mxu0 %v1925_v36  ;;  %812 = vmatprep.subr.mxu1 %v1927_v37 }
  0x62   : > { %742 = vmatpush1.msra.mxu0 %v1931_v38  ;;  %813 = vmatpush1.msra.mxu1 %v1933_v39 }
  0x63   : > { %743 = vmatprep.subr.mxu0 %v1937_v40  ;;  %814 = vmatprep.subr.mxu1 %v1939_v41 }
  0x64   : > { %744 = vmatpush1.msra.mxu0 %v1943_v42  ;;  %815 = vmatpush1.msra.mxu1 %v1945_v43 }
  0x65   : > { %745 = vmatprep.subr.mxu0 %v1949_v44  ;;  %816 = vmatprep.subr.mxu1 %v1951_v45 }
  0x66   : > { %746 = vmatpush1.msra.mxu0 %v1955_v46  ;;  %817 = vmatpush1.msra.mxu1 %v1957_v47 }
  0x67   : > { %747 = vmatprep.subr.mxu0 %v1961_v48  ;;  %818 = vmatprep.subr.mxu1 %v1963_v49 }
  0x68   : > { %748 = vmatpush1.msra.mxu0 %v1967_v50  ;;  %819 = vmatpush1.msra.mxu1 %v1969_v51 }
  0x69   : > { %749 = vmatprep.subr.mxu0 %v1973_v52  ;;  %820 = vmatprep.subr.mxu1 %v1975_v53 }
  0x6a   : > { %750 = vmatpush1.msra.mxu0 %v1979_v54  ;;  %821 = vmatpush1.msra.mxu1 %v1983_v55 }
  0x6b   : > { %751 = vmatprep.subr.mxu0 %v1988_v57  ;;  %822 = vmatprep.subr.mxu1 %v1990_v58 }
  0x6c   : > { %752 = vmatpush1.msra.mxu0 %v1994_v59  ;;  %823 = vmatpush1.msra.mxu1 %v1998_v60 }
  0x6d   : > { %753 = vmatprep.subr.mxu0 %v2000_v61  ;;  %824 = vmatprep.subr.mxu1 %v2004_v62 }
  0x6e   : > { %754 = vmatpush1.msra.mxu0 %v2008_v63  ;;  %825 = vmatpush1.msra.mxu1 %v2012_v0 }
  0x6f   : > { %755 = vmatprep.subr.mxu0 %v2017_v2  ;;  %826 = vmatprep.subr.mxu1 %v2019_v3  ;;  %v2480_v3 = vld [vmem:[#allocation42_spill] sm:$0xff] }
  0x70   : > { %756 = vmatpush1.msra.mxu0 %v2023_v4  ;;  %827 = vmatpush1.msra.mxu1 %v2027_v5 }
  0x71   : > { %757 = vmatprep.subr.mxu0 %v2029_v6  ;;  %828 = vmatprep.subr.mxu1 %v2033_v7 }
  0x72   : > { %758 = vmatpush1.msra.mxu0 %v2037_v8  ;;  %829 = vmatpush1.msra.mxu1 %v2041_v9 }
  0x73   : > { %759 = vmatprep.subr.mxu0 %v2046_v11  ;;  %830 = vmatprep.subr.mxu1 %v2478_v10 }
  0x74   : > { %760 = vmatpush1.msra.mxu0 %v2052_v13  ;;  %831 = vmatpush1.msra.mxu1 %v2479_v15  ;;  %v254_v15 = vld [vmem:[#allocation4] sm:$0xf] }
  0x75   : > { %761 = vmatprep.subr.mxu0 %v2480_v3  ;;  %832 = vmatprep.subr.mxu1 %v2062_v16  ;;  %v256_v16 = vlaneseq }
  0x76   : > { %762 = vmatpush1.msra.mxu0 %v2066_v17  ;;  %833 = vmatpush1.msra.mxu1 %v2068_v18 }
  0x77   : > { %763 = vmatprep.subr.mxu0 %v2072_v56  ;;  %834 = vmatprep.subr.mxu1 %v2074_v1  ;;  %v257_v17 = vshrl.u32 %v256_v16, 7 }
  0x78   : > { %764 = vmatpush1.msra.mxu0 %v2078_v12  ;;  %797 = vmatprep.mubr.f32.mxu0 %v2477_v14 }
  0x79   : > { %835 = vmatpush1.msra.mxu1 %v2082_v20  ;;  %868 = vmatprep.mubr.f32.mxu1 %v2477_v14  ;;  %v258_v18 = vsub.s32 0, %v257_v17  ;;  %v262_v13 = vsub.s32 1, %v257_v17  ;;  %v266_v12 = vsub.s32 2, %v257_v17  ;;  %v270_v14 = vsub.s32 3, %v257_v17 }
  0x7a   : > { %910 = vmatprep.subr.mxu0 %v1877_v19  ;;  %981 = vmatprep.subr.mxu1 %v1880_v21 }
  0x7b   : > { %v259_v10 = vrot.slane %v254_v15, %v258_v18  ;;  %v263_v8 = vrot.slane %v254_v15, %v262_v13  ;;  %v267_v19 = vrot.slane %v254_v15, %v266_v12  ;;  %v271_v16 = vrot.slane %v254_v15, %v270_v14 }
  0xef   : > { %v355_v3 = vpop.f32.mrf.mxu0 }
  0xf1   : > { %v444_v56 = vpop.f32.mrf.mxu1  ;;  %v357_v1 = vpop.f32.mrf.mxu0 }
  0xf3   : > { %v446_v9 = vpop.f32.mrf.mxu1 }
 0x103   : > { %v361_v11 = vpop.f32.mrf.mxu0 }
 0x104   : > { %v2158_v20 = vadd.f32 %v361_v11, %v259_v10 }
 0x105   : > { %v363_v7 = vpop.f32.mrf.mxu0 }
 0x106   : > { %2481 = vst [vmem:[#allocation50_spill] sm:$0xff] %v2158_v20  ;;  %v2160_v6 = vadd.f32 %v363_v7, %v263_v8 }
 0x107   : > { %v450_v21 = vpop.f32.mrf.mxu1 }
 0x108   : > { %2482 = vst [vmem:[#allocation51_spill] sm:$0xff] %v2160_v6  ;;  %v2162_v5 = vadd.f32 %v450_v21, %v267_v19 }
 0x109   : > { %v367_v4 = vpop.f32.mrf.mxu0  ;;  %v452_v2 = vpop.f32.mrf.mxu1 }
 0x10a   : > { %2483 = vst [vmem:[#allocation52_spill] sm:$0xff] %v2162_v5  ;;  %v2164_v0 = vadd.f32 %v367_v4, %v259_v10  ;;  %v2166_v18 = vadd.f32 %v452_v2, %v271_v16  ;;  %v358_v5 = vadd.f32 %v357_v1, %v263_v8 }
 0x10b   : > { %v369_v63 = vpop.f32.mrf.mxu0 }
 0x10c   : > { %2484 = vst [vmem:[#allocation53_spill] sm:$0xff] %v2164_v0  ;;  %2485 = vst [vmem:[#allocation54_spill] sm:$0xff] %v2166_v18  ;;  %v2168_v62 = vadd.f32 %v369_v63, %v263_v8  ;;  %v356_v63 = vadd.f32 %v355_v3, %v259_v10 }
 0x10d   : > { %v456_v11 = vpop.f32.mrf.mxu1 }
 0x10e   : > { %2486 = vst [vmem:[#allocation55_spill] sm:$0xff] %v2168_v62  ;;  %v2170_v13 = vadd.f32 %v456_v11, %v267_v19 }
 0x10f   : > { %v373_v17 = vpop.f32.mrf.mxu0  ;;  %v458_v12 = vpop.f32.mrf.mxu1 }
 0x110   : > { %2487 = vst [vmem:[#allocation56_spill] sm:$0xff] %v2170_v13  ;;  %v2172_v7 = vadd.f32 %v373_v17, %v259_v10  ;;  %v2174_v6 = vadd.f32 %v458_v12, %v271_v16 }
 0x111   : > { %v375_v21 = vpop.f32.mrf.mxu0 }
 0x112   : > { %2488 = vst [vmem:[#allocation57_spill] sm:$0xff] %v2172_v7  ;;  %2489 = vst [vmem:[#allocation58_spill] sm:$0xff] %v2174_v6  ;;  %v2176_v14 = vadd.f32 %v375_v21, %v263_v8  ;;  %v447_v21 = vadd.f32 %v446_v9, %v271_v16  ;;  %v445_v6 = vadd.f32 %v444_v56, %v267_v19  ;;  %v548_v8 = vld [vmem:[#allocation9] sm:$0xff] }
 0x113   : > { %v462_v15 = vpop.f32.mrf.mxu1 }
 0x114   : > { %2490 = vst [vmem:[#allocation59_spill] sm:$0xff] %v2176_v14  ;;  %v2178_v4 = vadd.f32 %v462_v15, %v267_v19 }
 0x115   : > { %v464_v2 = vpop.f32.mrf.mxu1 }
 0x116   : > { %2491 = vst [vmem:[#allocation60_spill] sm:$0xff] %v2178_v4  ;;  %v2180_v0 = vadd.f32 %v464_v2, %v271_v16 }
 0x118   : > { %2492 = vst [vmem:[#allocation61_spill] sm:$0xff] %v2180_v0  ;;  %v622_v62 = vpop.f32.mrf.mxu0  ;;  %v693_v17 = vpop.f32.mrf.mxu1 }
 0x119   : > { %v698_v11 = vadd.f32 %v622_v62, %v356_v63  ;;  %v700_v61 = vadd.f32 %v693_v17, %v445_v6  ;;  %v2499_v63 = vld [vmem:[#allocation32_spill] sm:$0xff]  ;;  %v2501_v17 = vld [vmem:[#allocation34_spill] sm:$0xff] }
 0x11a   : > { %v624_v13 = vpop.f32.mrf.mxu0  ;;  %v695_v7 = vpop.f32.mrf.mxu1 }
 0x11b   : > { %v1601_v18 = vmul.f32 -1.442695, %v698_v11  ;;  %v699_v20 = vadd.f32 %v624_v13, %v358_v5  ;;  %v701_v14 = vadd.f32 %v695_v7, %v447_v21  ;;  %v2495_v13 = vld [vmem:[#allocation28_spill] sm:$0xff]  ;;  %v2496_v7 = vld [vmem:[#allocation29_spill] sm:$0xff] }
 0x11c   : > { %v2500_v11 = vld [vmem:[#allocation33_spill] sm:$0xff]  ;;  %v2503_v21 = vld [vmem:[#allocation36_spill] sm:$0xff] }
 0x11d   : > { %1687 = vpow2.f32 %v1601_v18  ;;  %v1602_v12 = vmul.f32 -1.442695, %v699_v20  ;;  %v1603_v15 = vmul.f32 -1.442695, %v701_v14  ;;  %v2497_v14 = vld [vmem:[#allocation30_spill] sm:$0xff] }
 0x11f   : > { %1689 = vpow2.f32 %v1602_v12  ;;  %v2502_v12 = vld [vmem:[#allocation35_spill] sm:$0xff] }
 0x120   : > { %1691 = vpow2.f32 %v1603_v15  ;;  %v2504_v15 = vld [vmem:[#allocation37_spill] sm:$0xff] }
 0x12a   : > { %v1688_v4 = vpop.eup %1687 }
 0x12b   : > { %v705_v2 = vadd.f32 1.0, %v1688_v4  ;;  %v2498_v4 = vld [vmem:[#allocation31_spill] sm:$0xff] }
 0x12c   : > { %v1690_v0 = vpop.eup %1689 }
 0x12d   : > { %1693 = vrcp.f32 %v705_v2  ;;  %v711_v3 = vadd.f32 1.0, %v1690_v0  ;;  %v1692_v62 = vpop.eup %1691  ;;  %v2494_v0 = vld [vmem:[#allocation27_spill] sm:$0xff]  ;;  %v2505_v2 = vld [vmem:[#allocation38_spill] sm:$0xff] }
 0x12e   : > { %1695 = vtanh.f32 %v700_v61  ;;  %v718_v10 = vadd.f32 1.0, %v1692_v62  ;;  %v2493_v61 = vld [vmem:[#allocation26_spill] sm:$0xff]  ;;  %v2507_v62 = vld [vmem:[#allocation40_spill] sm:$0xff] }
 0x12f   : > { %1697 = vrcp.f32 %v711_v3  ;;  %v2506_v3 = vld [vmem:[#allocation39_spill] sm:$0xff] }
 0x130   : > { %1699 = vrcp.f32 %v718_v10  ;;  %v2512_v10 = vld [vmem:[#allocation45_spill] sm:$0xff] }
 0x13a   : > { %v1694_v5 = vpop.eup %1693 }
 0x13b   : > { %v1696_v1 = vpop.eup %1695 }
 0x13c   : > { %v1698_v20 = vpop.eup %1697  ;;  %v722_v18 = vmul.f32 %v1696_v1, %v1694_v5  ;;  %v2508_v5 = vld [vmem:[#allocation41_spill] sm:$0xff]  ;;  %v2510_v1 = vld [vmem:[#allocation43_spill] sm:$0xff] }
 0x13d   : > { %v721_v9 = vmul.f32 %v1698_v20, %v548_v8  ;;  %v1700_v19 = vpop.eup %1699  ;;  %v2509_v8 = vld [vmem:[#allocation42_spill] sm:$0xff]  ;;  %v2511_v20 = vld [vmem:[#allocation44_spill] sm:$0xff] }
 0x13f   : > { %v2182_v16 = vadd.f32 %v722_v18, %v721_v9  ;;  %v2513_v18 = vld [vmem:[#allocation46_spill] sm:$0xff]  ;;  %v2514_v9 = vld [vmem:[#allocation47_spill] sm:$0xff] }
 0x141   : > { %1701 = vtanh.f32 %v2182_v16 }
 0x14e   : > { %v1702_v6 = vpop.eup %1701 }
 0x14f   : > { %v725_v56 = vmul.f32 %v1702_v6, %v1700_v19  ;;  %v2515_v19 = vld [vmem:[#allocation48_spill] sm:$0xff]  ;;  %v2516_v6 = vmov 0.0  }
 0x151   : > { %798 = vmatmul.mubr.f32.vlgmr.msra.gmra.mxu0 %v725_v56  ;;  %869 = vmatmul.mubr.f32.vlgmr.msra.gmra.mxu1 %v725_v56  ;;  %v2517_v56 = vld [vmem:[#allocation49_spill] sm:$0xff] }
 0x152   : > { %911 = vmatpush1.msra.mxu0 %v1883_v22  ;;  %982 = vmatpush1.msra.mxu1 %v1885_v23 }
 0x153   : > { %912 = vmatprep.subr.mxu0 %v1889_v24  ;;  %983 = vmatprep.subr.mxu1 %v1891_v25 }
 0x154   : > { %913 = vmatpush1.msra.mxu0 %v1895_v26  ;;  %984 = vmatpush1.msra.mxu1 %v1897_v27 }
 0x155   : > { %914 = vmatprep.subr.mxu0 %v1901_v28  ;;  %985 = vmatprep.subr.mxu1 %v1903_v29 }
 0x156   : > { %915 = vmatpush1.msra.mxu0 %v1907_v30  ;;  %986 = vmatpush1.msra.mxu1 %v1909_v31 }
 0x157   : > { %916 = vmatprep.subr.mxu0 %v1913_v32  ;;  %987 = vmatprep.subr.mxu1 %v1915_v33 }
 0x158   : > { %917 = vmatpush1.msra.mxu0 %v1919_v34  ;;  %988 = vmatpush1.msra.mxu1 %v1921_v35 }
 0x159   : > { %918 = vmatprep.subr.mxu0 %v1925_v36  ;;  %989 = vmatprep.subr.mxu1 %v1927_v37 }
 0x15a   : > { %919 = vmatpush1.msra.mxu0 %v1931_v38  ;;  %990 = vmatpush1.msra.mxu1 %v1933_v39 }
 0x15b   : > { %920 = vmatprep.subr.mxu0 %v1937_v40  ;;  %991 = vmatprep.subr.mxu1 %v1939_v41 }
 0x15c   : > { %921 = vmatpush1.msra.mxu0 %v1943_v42  ;;  %992 = vmatpush1.msra.mxu1 %v1945_v43 }
 0x15d   : > { %922 = vmatprep.subr.mxu0 %v1949_v44  ;;  %993 = vmatprep.subr.mxu1 %v1951_v45 }
 0x15e   : > { %923 = vmatpush1.msra.mxu0 %v1955_v46  ;;  %994 = vmatpush1.msra.mxu1 %v1957_v47 }
 0x15f   : > { %924 = vmatprep.subr.mxu0 %v1961_v48  ;;  %995 = vmatprep.subr.mxu1 %v1963_v49 }
 0x160   : > { %925 = vmatpush1.msra.mxu0 %v1967_v50  ;;  %996 = vmatpush1.msra.mxu1 %v1969_v51 }
 0x161   : > { %926 = vmatprep.subr.mxu0 %v1973_v52  ;;  %997 = vmatprep.subr.mxu1 %v1975_v53 }
 0x162   : > { %927 = vmatpush1.msra.mxu0 %v1979_v54  ;;  %998 = vmatpush1.msra.mxu1 %v1983_v55 }
 0x163   : > { %928 = vmatprep.subr.mxu0 %v1988_v57  ;;  %999 = vmatprep.subr.mxu1 %v1990_v58 }
 0x164   : > { %929 = vmatpush1.msra.mxu0 %v1994_v59  ;;  %1000 = vmatpush1.msra.mxu1 %v1998_v60 }
 0x165   : > { %930 = vmatprep.subr.mxu0 %v2493_v61  ;;  %1001 = vmatprep.subr.mxu1 %v2494_v0 }
 0x166   : > { %931 = vmatpush1.msra.mxu0 %v2495_v13  ;;  %1002 = vmatpush1.msra.mxu1 %v2496_v7 }
 0x167   : > { %932 = vmatprep.subr.mxu0 %v2497_v14  ;;  %1003 = vmatprep.subr.mxu1 %v2498_v4 }
 0x168   : > { %933 = vmatpush1.msra.mxu0 %v2499_v63  ;;  %1004 = vmatpush1.msra.mxu1 %v2500_v11 }
 0x169   : > { %934 = vmatprep.subr.mxu0 %v2501_v17  ;;  %1005 = vmatprep.subr.mxu1 %v2502_v12  ;;  %v2523_v12 = vld [vmem:[#allocation52_spill] sm:$0xff] }
 0x16a   : > { %935 = vmatpush1.msra.mxu0 %v2503_v21  ;;  %1006 = vmatpush1.msra.mxu1 %v2504_v15  ;;  %v2522_v21 = vld [vmem:[#allocation54_spill] sm:$0xff] }
 0x16b   : > { %936 = vmatprep.subr.mxu0 %v2505_v2  ;;  %1007 = vmatprep.subr.mxu1 %v2506_v3 }
 0x16c   : > { %937 = vmatpush1.msra.mxu0 %v2507_v62  ;;  %1008 = vmatpush1.msra.mxu1 %v2508_v5  ;;  %v2518_v5 = vld [vmem:[#allocation24_spill] sm:$0xff] }
 0x16d   : > { %938 = vmatprep.subr.mxu0 %v2509_v8  ;;  %1009 = vmatprep.subr.mxu1 %v2510_v1  ;;  %v2519_v8 = vld [vmem:[#allocation25_spill] sm:$0xff] }
 0x16e   : > { %939 = vmatpush1.msra.mxu0 %v2511_v20  ;;  %1010 = vmatpush1.msra.mxu1 %v2512_v10  ;;  %v2520_v20 = vld [vmem:[#allocation50_spill] sm:$0xff] }
 0x16f   : > { %940 = vmatprep.subr.mxu0 %v2513_v18  ;;  %1011 = vmatprep.subr.mxu1 %v2514_v9  ;;  %v2521_v18 = vld [vmem:[#allocation51_spill] sm:$0xff] }
 0x170   : > { %941 = vmatpush1.msra.mxu0 %v2515_v19  ;;  %974 = vmatprep.mubr.f32.mxu0 %v2516_v6 }
 0x171   : > { %1012 = vmatpush1.msra.mxu1 %v2517_v56  ;;  %1045 = vmatprep.mubr.f32.mxu1 %v2516_v6 }
 0x172   : > { %1087 = vmatprep.subr.mxu0 %v2518_v5  ;;  %1158 = vmatprep.subr.mxu1 %v2519_v8 }
 0x211   : > { %v799_v1 = vpop.f32.mrf.mxu0  ;;  %v870_v9 = vpop.f32.mrf.mxu1 }
 0x212   : > { %v875_v62 = vadd.f32 %v799_v1, %v2520_v20  ;;  %v877_v6 = vadd.f32 %v870_v9, %v2523_v12 }
 0x213   : > { %v801_v10 = vpop.f32.mrf.mxu0  ;;  %v872_v15 = vpop.f32.mrf.mxu1 }
 0x214   : > { %v1604_v3 = vmul.f32 -1.442695, %v875_v62  ;;  %v876_v2 = vadd.f32 %v801_v10, %v2521_v18  ;;  %v878_v56 = vadd.f32 %v872_v15, %v2522_v21 }
 0x216   : > { %1703 = vpow2.f32 %v1604_v3  ;;  %v1605_v19 = vmul.f32 -1.442695, %v876_v2  ;;  %v1606_v17 = vmul.f32 -1.442695, %v878_v56  ;;  %v2546_v56 = vld [vmem:[#allocation57_spill] sm:$0xff] }
 0x218   : > { %1705 = vpow2.f32 %v1605_v19 }
 0x219   : > { %1707 = vtanh.f32 %v877_v6 }
 0x21a   : > { %1709 = vpow2.f32 %v1606_v17 }
 0x223   : > { %v1704_v5 = vpop.eup %1703 }
 0x224   : > { %v882_v11 = vadd.f32 1.0, %v1704_v5 }
 0x225   : > { %v1706_v8 = vpop.eup %1705 }
 0x226   : > { %1711 = vrcp.f32 %v882_v11  ;;  %v888_v1 = vadd.f32 1.0, %v1706_v8  ;;  %v1708_v62 = vpop.eup %1707 }
 0x227   : > { %v1710_v20 = vpop.eup %1709 }
 0x228   : > { %1713 = vrcp.f32 %v888_v1  ;;  %v895_v18 = vadd.f32 1.0, %v1710_v20 }
 0x22a   : > { %1715 = vrcp.f32 %v895_v18  ;;  %v2548_v18 = vld [vmem:[#allocation61_spill] sm:$0xff] }
 0x233   : > { %v1712_v3 = vpop.eup %1711 }
 0x234   : > { %v899_v10 = vmul.f32 %v1712_v3, %v1708_v62  ;;  %v2547_v62 = vld [vmem:[#allocation59_spill] sm:$0xff] }
 0x235   : > { %v1714_v2 = vpop.eup %1713 }
 0x236   : > { %v898_v19 = vmul.f32 %v1714_v2, %v2182_v16 }
 0x237   : > { %v1716_v12 = vpop.eup %1715 }
 0x238   : > { %v2256_v21 = vadd.f32 %v899_v10, %v898_v19 }
 0x23a   : > { %1717 = vtanh.f32 %v2256_v21 }
 0x247   : > { %v1718_v15 = vpop.eup %1717 }
 0x248   : > { %v902_v9 = vmul.f32 %v1718_v15, %v1716_v12 }
 0x24a   : > { %975 = vmatmul.mubr.f32.vlgmr.msra.gmra.mxu0 %v902_v9  ;;  %1046 = vmatmul.mubr.f32.vlgmr.msra.gmra.mxu1 %v902_v9 }
 0x24b   : > { %1088 = vmatpush1.msra.mxu0 %v1883_v22  ;;  %1159 = vmatpush1.msra.mxu1 %v1885_v23  ;;  %v2524_v22 = vld [vmem:[#allocation33_spill] sm:$0xff]  ;;  %v2525_v23 = vld [vmem:[#allocation34_spill] sm:$0xff] }
 0x24c   : > { %1089 = vmatprep.subr.mxu0 %v1889_v24  ;;  %1160 = vmatprep.subr.mxu1 %v1891_v25  ;;  %v2526_v24 = vld [vmem:[#allocation35_spill] sm:$0xff]  ;;  %v2527_v25 = vld [vmem:[#allocation36_spill] sm:$0xff] }
 0x24d   : > { %1090 = vmatpush1.msra.mxu0 %v1895_v26  ;;  %1161 = vmatpush1.msra.mxu1 %v1897_v27  ;;  %v2528_v26 = vld [vmem:[#allocation37_spill] sm:$0xff]  ;;  %v2529_v27 = vld [vmem:[#allocation38_spill] sm:$0xff] }
 0x24e   : > { %1091 = vmatprep.subr.mxu0 %v1901_v28  ;;  %1162 = vmatprep.subr.mxu1 %v1903_v29  ;;  %v2530_v28 = vld [vmem:[#allocation39_spill] sm:$0xff]  ;;  %v2531_v29 = vld [vmem:[#allocation40_spill] sm:$0xff] }
 0x24f   : > { %1092 = vmatpush1.msra.mxu0 %v1907_v30  ;;  %1163 = vmatpush1.msra.mxu1 %v1909_v31  ;;  %v2532_v30 = vld [vmem:[#allocation41_spill] sm:$0xff]  ;;  %v2533_v31 = vld [vmem:[#allocation42_spill] sm:$0xff] }
 0x250   : > { %1093 = vmatprep.subr.mxu0 %v1913_v32  ;;  %1164 = vmatprep.subr.mxu1 %v1915_v33  ;;  %v2534_v32 = vld [vmem:[#allocation43_spill] sm:$0xff]  ;;  %v2535_v33 = vld [vmem:[#allocation44_spill] sm:$0xff] }
 0x251   : > { %1094 = vmatpush1.msra.mxu0 %v1919_v34  ;;  %1165 = vmatpush1.msra.mxu1 %v1921_v35  ;;  %v2536_v34 = vld [vmem:[#allocation45_spill] sm:$0xff]  ;;  %v2537_v35 = vld [vmem:[#allocation46_spill] sm:$0xff] }
 0x252   : > { %1095 = vmatprep.subr.mxu0 %v1925_v36  ;;  %1166 = vmatprep.subr.mxu1 %v1927_v37  ;;  %v2538_v36 = vld [vmem:[#allocation47_spill] sm:$0xff]  ;;  %v2539_v37 = vld [vmem:[#allocation48_spill] sm:$0xff] }
 0x253   : > { %1096 = vmatpush1.msra.mxu0 %v1931_v38  ;;  %1167 = vmatpush1.msra.mxu1 %v1933_v39  ;;  %v2540_v38 = vmov 0.0   ;;  %v2541_v39 = vld [vmem:[#allocation49_spill] sm:$0xff] }
 0x254   : > { %1097 = vmatprep.subr.mxu0 %v1937_v40  ;;  %1168 = vmatprep.subr.mxu1 %v1939_v41  ;;  %v2542_v41 = vld [vmem:[#allocation53_spill] sm:$0xff] }
 0x255   : > { %1098 = vmatpush1.msra.mxu0 %v1943_v42  ;;  %1169 = vmatpush1.msra.mxu1 %v1945_v43 }
 0x256   : > { %1099 = vmatprep.subr.mxu0 %v1949_v44  ;;  %1170 = vmatprep.subr.mxu1 %v1951_v45  ;;  %v2543_v45 = vld [vmem:[#allocation55_spill] sm:$0xff] }
 0x257   : > { %1100 = vmatpush1.msra.mxu0 %v1955_v46  ;;  %1171 = vmatpush1.msra.mxu1 %v1957_v47 }
 0x258   : > { %1101 = vmatprep.subr.mxu0 %v1961_v48  ;;  %1172 = vmatprep.subr.mxu1 %v1963_v49 }
 0x259   : > { %1102 = vmatpush1.msra.mxu0 %v1967_v50  ;;  %1173 = vmatpush1.msra.mxu1 %v1969_v51  ;;  %v2544_v50 = vld [vmem:[#allocation58_spill] sm:$0xff] }
 0x25a   : > { %1103 = vmatprep.subr.mxu0 %v1973_v52  ;;  %1174 = vmatprep.subr.mxu1 %v1975_v53  ;;  %v2545_v52 = vld [vmem:[#allocation56_spill] sm:$0xff] }
 0x25b   : > { %1104 = vmatpush1.msra.mxu0 %v1979_v54  ;;  %1175 = vmatpush1.msra.mxu1 %v1983_v55 }
 0x25c   : > { %1105 = vmatprep.subr.mxu0 %v1988_v57  ;;  %1176 = vmatprep.subr.mxu1 %v1990_v58 }
 0x25d   : > { %1106 = vmatpush1.msra.mxu0 %v1994_v59  ;;  %1177 = vmatpush1.msra.mxu1 %v1998_v60 }
 0x25e   : > { %1107 = vmatprep.subr.mxu0 %v2493_v61  ;;  %1178 = vmatprep.subr.mxu1 %v2494_v0 }
 0x25f   : > { %1108 = vmatpush1.msra.mxu0 %v2495_v13  ;;  %1179 = vmatpush1.msra.mxu1 %v2496_v7 }
 0x260   : > { %1109 = vmatprep.subr.mxu0 %v2497_v14  ;;  %1180 = vmatprep.subr.mxu1 %v2498_v4 }
 0x261   : > { %1110 = vmatpush1.msra.mxu0 %v2499_v63  ;;  %1181 = vmatpush1.msra.mxu1 %v2524_v22 }
 0x262   : > { %1111 = vmatprep.subr.mxu0 %v2525_v23  ;;  %1182 = vmatprep.subr.mxu1 %v2526_v24 }
 0x263   : > { %1112 = vmatpush1.msra.mxu0 %v2527_v25  ;;  %1183 = vmatpush1.msra.mxu1 %v2528_v26 }
 0x264   : > { %1113 = vmatprep.subr.mxu0 %v2529_v27  ;;  %1184 = vmatprep.subr.mxu1 %v2530_v28 }
 0x265   : > { %1114 = vmatpush1.msra.mxu0 %v2531_v29  ;;  %1185 = vmatpush1.msra.mxu1 %v2532_v30 }
 0x266   : > { %1115 = vmatprep.subr.mxu0 %v2533_v31  ;;  %1186 = vmatprep.subr.mxu1 %v2534_v32 }
 0x267   : > { %1116 = vmatpush1.msra.mxu0 %v2535_v33  ;;  %1187 = vmatpush1.msra.mxu1 %v2536_v34 }
 0x268   : > { %1117 = vmatprep.subr.mxu0 %v2537_v35  ;;  %1188 = vmatprep.subr.mxu1 %v2538_v36 }
 0x269   : > { %1118 = vmatpush1.msra.mxu0 %v2539_v37  ;;  %1151 = vmatprep.mubr.f32.mxu0 %v2540_v38 }
 0x26a   : > { %1189 = vmatpush1.msra.mxu1 %v2541_v39  ;;  %1222 = vmatprep.mubr.f32.mxu1 %v2540_v38 }
 0x30a   : > { %v976_v40 = vpop.f32.mrf.mxu0  ;;  %v1047_v47 = vpop.f32.mrf.mxu1 }
 0x30b   : > { %v1052_v42 = vadd.f32 %v976_v40, %v2542_v41  ;;  %v1054_v53 = vadd.f32 %v1047_v47, %v2545_v52 }
 0x30c   : > { %v978_v43 = vpop.f32.mrf.mxu0  ;;  %v1049_v49 = vpop.f32.mrf.mxu1 }
 0x30d   : > { %v1607_v44 = vmul.f32 -1.442695, %v1052_v42  ;;  %v1053_v46 = vadd.f32 %v978_v43, %v2543_v45  ;;  %v1055_v51 = vadd.f32 %v1049_v49, %v2544_v50 }
 0x30f   : > { %1719 = vpow2.f32 %v1607_v44  ;;  %v1608_v48 = vmul.f32 -1.442695, %v1053_v46  ;;  %v1609_v54 = vmul.f32 -1.442695, %v1055_v51 }
 0x311   : > { %1721 = vpow2.f32 %v1608_v48 }
 0x312   : > { %1723 = vtanh.f32 %v1054_v53 }
 0x313   : > { %1725 = vpow2.f32 %v1609_v54 }
 0x31c   : > { %v1720_v55 = vpop.eup %1719 }
 0x31d   : > { %v1059_v57 = vadd.f32 1.0, %v1720_v55 }
 0x31e   : > { %v1722_v58 = vpop.eup %1721 }
 0x31f   : > { %1727 = vrcp.f32 %v1059_v57  ;;  %v1065_v59 = vadd.f32 1.0, %v1722_v58  ;;  %v1724_v60 = vpop.eup %1723 }
 0x320   : > { %v1726_v16 = vpop.eup %1725 }
 0x321   : > { %1729 = vrcp.f32 %v1065_v59  ;;  %v1072_v7 = vadd.f32 1.0, %v1726_v16 }
 0x323   : > { %1731 = vrcp.f32 %v1072_v7 }
 0x32c   : > { %v1728_v61 = vpop.eup %1727 }
 0x32d   : > { %v1076_v0 = vmul.f32 %v1728_v61, %v1724_v60 }
 0x32e   : > { %v1730_v13 = vpop.eup %1729 }
 0x32f   : > { %v1075_v14 = vmul.f32 %v1730_v13, %v2256_v21  ;;  %v2549_v21 = vld [vmem:[#allocation60_spill] sm:$0xff] }
 0x330   : > { %v1732_v63 = vpop.eup %1731 }
 0x331   : > { %v1077_v4 = vadd.f32 %v1076_v0, %v1075_v14 }
 0x333   : > { %1733 = vtanh.f32 %v1077_v4 }
 0x340   : > { %v1734_v11 = vpop.eup %1733 }
 0x341   : > { %v1079_v17 = vmul.f32 %v1734_v11, %v1732_v63 }
 0x343   : > { %1152 = vmatmul.mubr.f32.vlgmr.msra.gmra.mxu0 %v1079_v17  ;;  %1223 = vmatmul.mubr.f32.vlgmr.msra.gmra.mxu1 %v1079_v17 }
 0x403   : > { %v1153_v6 = vpop.f32.mrf.mxu0  ;;  %v1224_v3 = vpop.f32.mrf.mxu1 }
 0x404   : > { %v1229_v5 = vadd.f32 %v1153_v6, %v2546_v56  ;;  %v1231_v12 = vadd.f32 %v1224_v3, %v2549_v21 }
 0x405   : > { %v1155_v8 = vpop.f32.mrf.mxu0  ;;  %v1226_v2 = vpop.f32.mrf.mxu1 }
 0x406   : > { %v1610_v1 = vmul.f32 -1.442695, %v1229_v5  ;;  %v1230_v20 = vadd.f32 %v1155_v8, %v2547_v62  ;;  %v1232_v19 = vadd.f32 %v1226_v2, %v2548_v18 }
 0x408   : > { %1735 = vpow2.f32 %v1610_v1  ;;  %v1611_v10 = vmul.f32 -1.442695, %v1230_v20  ;;  %v1612_v15 = vmul.f32 -1.442695, %v1232_v19 }
 0x40a   : > { %1737 = vpow2.f32 %v1611_v10 }
 0x40b   : > { %1739 = vtanh.f32 %v1231_v12 }
 0x40c   : > { %1741 = vpow2.f32 %v1612_v15 }
 0x415   : > { %v1736_v9 = vpop.eup %1735 }
 0x416   : > { %v1236_v22 = vadd.f32 1.0, %v1736_v9 }
 0x417   : > { %v1738_v23 = vpop.eup %1737 }
 0x418   : > { %1743 = vrcp.f32 %v1236_v22  ;;  %v1242_v24 = vadd.f32 1.0, %v1738_v23  ;;  %v1740_v25 = vpop.eup %1739 }
 0x419   : > { %v1742_v26 = vpop.eup %1741 }
 0x41a   : > { %1745 = vrcp.f32 %v1242_v24  ;;  %v1249_v30 = vadd.f32 1.0, %v1742_v26 }
 0x41c   : > { %1747 = vrcp.f32 %v1249_v30 }
 0x425   : > { %v1744_v27 = vpop.eup %1743 }
 0x426   : > { %v1253_v28 = vmul.f32 %v1744_v27, %v1740_v25 }
 0x427   : > { %v1746_v29 = vpop.eup %1745 }
 0x428   : > { %v1252_v31 = vmul.f32 %v1746_v29, %v1077_v4 }
 0x429   : > { %v1748_v33 = vpop.eup %1747 }
 0x42a   : > { %v1254_v32 = vadd.f32 %v1253_v28, %v1252_v31 }
 0x42c   : > { %1749 = vtanh.f32 %v1254_v32  ;;  %1258 = vst [vmem:[#allocation9] sm:$0xff] %v1254_v32 }
 0x438   : > { %1262 = sbr.rel (%p1613_p10) target bundleno = 1326 (0x52e), region = 100 }
 0x439   : > { %v1750_v34 = vpop.eup %1749 }
 0x43a   : > { %v1256_v35 = vmul.f32 %v1750_v34, %v1748_v33 }
 0x43c   : > { %1257 = vst [vmem:[#allocation8] sm:$0xff] %v1256_v35 }
 0x43d   : > { %v1297_v36 = vld [vmem:[%s2394_s4] sm:$0xff]  ;;  %v1299_v37 = vld [vmem:[%s2394_s4 + $0x8] sm:$0xff]  ;;  %v1301_v38 = vld [vmem:[%s2394_s4 + $0x10] sm:$0xff] }
 0x43e   : > { %v1303_v39 = vld [vmem:[%s2394_s4 + $0x18] sm:$0xff]  ;;  %v1305_v40 = vld [vmem:[%s2394_s4 + $0x20] sm:$0xff]  ;;  %v1307_v41 = vld [vmem:[%s2394_s4 + $0x28] sm:$0xff] }
 0x43f   : > { %v1309_v42 = vld [vmem:[%s2394_s4 + $0x30] sm:$0xff]  ;;  %v1311_v43 = vld [vmem:[%s2394_s4 + $0x38] sm:$0xff]  ;;  %v1313_v44 = vld [vmem:[%s2394_s4 + $0x40] sm:$0xff] }
 0x440   : > { %v1315_v45 = vld [vmem:[%s2394_s4 + $0x48] sm:$0xff]  ;;  %v1317_v46 = vld [vmem:[%s2394_s4 + $0x50] sm:$0xff]  ;;  %v1319_v47 = vld [vmem:[%s2394_s4 + $0x58] sm:$0xff] }
 0x441   : > { %v1321_v48 = vld [vmem:[%s2394_s4 + $0x60] sm:$0xff]  ;;  %v1323_v49 = vld [vmem:[%s2394_s4 + $0x68] sm:$0xff]  ;;  %v1325_v50 = vld [vmem:[%s2394_s4 + $0x70] sm:$0xff] }
 0x442   : > { %v1327_v51 = vld [vmem:[%s2394_s4 + $0x78] sm:$0xff] }
 0x443   : > { %1336 = vsyncadd [#allocation10 + $0x3], 2048  ;;  %v1356_v52 = vld [vmem:[%s2395_s5] sm:$0x1] }
 0x444   : > { %1357 = vst [vmem:[#allocation6] sm:$0x1] %v1356_v52 }
 0x445   : > { %1383 = vsyncadd [#allocation10 + $0x4], 16 }
 0x446   : > { %1781 = dma.done.wait [#allocation10 + $0x3], 2048 }
 0x447   : > { %1782 = vsyncadd [#allocation10 + $0x3], 4294965248 }
 0x448   : > { %1783 = dma.done.wait [#allocation10 + $0x4], 16 }
 0x449   : > { %1784 = vsyncadd [#allocation10 + $0x4], 4294967280  ;;  %v1792_v53 = vmov 0.0   ;;  %vm1793_vm1 = vmmov 0   ;;  %vm1483_vm2 = vcmask 31744  }
 0x44a   : > { %1639 = vmatprep.subr.mxu0 %v1792_v53  ;;  %1671 = vmatprep.mubr.msk.f32.mxu0 %vm1793_vm1, %v1792_v53 }
 0x44b   : > { %1640 = vmatpush3.msra.mxu0 %v1327_v51  ;;  %v1614_v54 = vld [vmem:[#allocation6] ss:$0 sm:$0xff] }
 0x44c   : > { %1641 = vmatprep.subr.mxu0 %v1792_v53 }
 0x44d   : > { %1642 = vmatpush3.msra.mxu0 %v1325_v50 }
 0x44e   : > { %1643 = vmatprep.subr.mxu0 %v1792_v53 }
 0x44f   : > { %1644 = vmatpush3.msra.mxu0 %v1323_v49 }
 0x450   : > { %1645 = vmatprep.subr.mxu0 %v1792_v53 }
 0x451   : > { %1646 = vmatpush3.msra.mxu0 %v1321_v48 }
 0x452   : > { %1647 = vmatprep.subr.mxu0 %v1792_v53 }
 0x453   : > { %1648 = vmatpush3.msra.mxu0 %v1319_v47 }
 0x454   : > { %1649 = vmatprep.subr.mxu0 %v1792_v53 }
 0x455   : > { %1650 = vmatpush3.msra.mxu0 %v1317_v46 }
 0x456   : > { %1651 = vmatprep.subr.mxu0 %v1792_v53 }
 0x457   : > { %1652 = vmatpush3.msra.mxu0 %v1315_v45 }
 0x458   : > { %1653 = vmatprep.subr.mxu0 %v1792_v53 }
 0x459   : > { %1654 = vmatpush3.msra.mxu0 %v1313_v44 }
 0x45a   : > { %1655 = vmatprep.subr.mxu0 %v1792_v53 }
 0x45b   : > { %1656 = vmatpush3.msra.mxu0 %v1311_v43 }
 0x45c   : > { %1657 = vmatprep.subr.mxu0 %v1792_v53 }
 0x45d   : > { %1658 = vmatpush3.msra.mxu0 %v1309_v42 }
 0x45e   : > { %1659 = vmatprep.subr.mxu0 %v1792_v53 }
 0x45f   : > { %1660 = vmatpush3.msra.mxu0 %v1307_v41 }
 0x460   : > { %1661 = vmatprep.subr.mxu0 %v1792_v53 }
 0x461   : > { %1662 = vmatpush3.msra.mxu0 %v1305_v40 }
 0x462   : > { %1663 = vmatprep.subr.mxu0 %v1792_v53 }
 0x463   : > { %1664 = vmatpush3.msra.mxu0 %v1303_v39 }
 0x464   : > { %1665 = vmatprep.subr.mxu0 %v1792_v53 }
 0x465   : > { %1666 = vmatpush3.msra.mxu0 %v1301_v38 }
 0x466   : > { %1667 = vmatprep.subr.mxu0 %v1792_v53 }
 0x467   : > { %1668 = vmatpush3.msra.mxu0 %v1299_v37 }
 0x468   : > { %1669 = vmatprep.subr.mxu0 %v1792_v53 }
 0x469   : > { %1670 = vmatpush3.msra.mxu0 %v1297_v36 }
 0x46a   : > { %1672 = vmatmul.mubr.f32.vlgmr.msra.gmra.mxu0 %v1256_v35 }
 0x52a   : > { %v1479_v55 = vpop.f32.mrf.mxu0 }
 0x52b   : > { %v1480_v57 = vadd.f32 %v1614_v54, %v1479_v55 }
 0x52c   : > { %v1673_v58 = vpop.f32.mrf.mxu0 }
 0x52d   : > { %1484 = vst.msk [vmem:[%s2396_s6] sm:$0xff] %vm1483_vm2, %v1480_v57 }
 0x52e PF: > { %s16_s21 = sadd.s32 1, %s1787_s21  }
 0x52f   : > { %p13_p11 = scmp.ge.s32.totalorder %s16_s21, 4  }
 0x531   :  { %15 = sbr.rel (!%p13_p11) target bundleno = 1 (0x1), region = 238 }
 0x536   :  { %1496 = vsyncmov [#allocation10] }
 0x539   :  { %s1497_s17 = vpop.sfrf %1496 }
 0x53a   :  { %p1617_p12 = scmp.ne.s32.totalorder %s1497_s17, 0 }
 0x53c   :  { %1501 = shalt.err (%p1617_p12)  }
 0x53d   :  { %1503 = vsyncmov [#allocation10 + $0x1] }
 0x540   :  { %s1504_s18 = vpop.sfrf %1503 }
 0x541   :  { %p1618_p13 = scmp.ne.s32.totalorder %s1504_s18, 0 }
 0x543   :  { %1508 = shalt.err (%p1618_p13)  }
 0x544   :  { %1510 = vsyncmov [#allocation10 + $0x2] }
 0x547   :  { %s1511_s19 = vpop.sfrf %1510 }
 0x548   :  { %p1619_p0 = scmp.ne.s32.totalorder %s1511_s19, 0 }
 0x54a   :  { %1515 = shalt.err (%p1619_p0)  }
 0x54b   :  { %1517 = vsyncmov [#allocation10 + $0x3] }
 0x54e   :  { %s1518_s20 = vpop.sfrf %1517 }
 0x54f   :  { %p1620_p1 = scmp.ne.s32.totalorder %s1518_s20, 0 }
 0x551   :  { %1522 = shalt.err (%p1620_p1)  }
 0x552   :  { %1524 = vsyncmov [#allocation10 + $0x4] }
 0x555   :  { %s1525_s23 = vpop.sfrf %1524 }
 0x556   :  { %p1621_p2 = scmp.ne.s32.totalorder %s1525_s23, 0 }
 0x558   :  { %1529 = shalt.err (%p1621_p2)  }

</bundles_post_ra>
